<compile_context>
chip_gen: v7x
topology: tpu7x:2x2x1
jax: 0.10.0
libtpu: 0.0.40
codegen_flags: <defaults>
</compile_context>

<pallas_src>
import functools
import math

import jax
import jax.numpy as jnp
from jax.experimental import pallas as pl
from jax.experimental.pallas import tpu as pltpu  # noqa: F401  (TPU backend assumed)

# ----------------------------- model config ---------------------------------
N_INPUTS = 4       # nInputs
D_MODEL = 32       # dModel
N_HEAD = 4         # nHead
N_LAYERS = 2       # nLayers
DIM_FF = 64        # dimFeedForward
N_OUTPUT = 8       # nOutput
HEAD_DIM = D_MODEL // N_HEAD
LN_EPS = 1e-5
N_OUT_PAD = 128    # lane-dense padded output width (sliced back to N_OUTPUT)

BATCH = 2
SEQ = 8


# ------------------------------ kernel helpers -------------------------------
def _layernorm(h, gamma, beta):
    mu = jnp.mean(h, axis=-1, keepdims=True)
    d = h - mu
    var = jnp.mean(d * d, axis=-1, keepdims=True)
    return d * jax.lax.rsqrt(var + LN_EPS) * gamma + beta


def _softmax_last(z, approx):
    z = z - jnp.max(z, axis=-1, keepdims=True)
    e = jnp.exp(z)
    return e * pl.reciprocal(jnp.sum(e, axis=-1, keepdims=True), approx=approx)


# ------------------------------ Pallas kernel --------------------------------
def transformer_kernel(
    x_ref, pos_ref, wp_ref, bp_ref,
    wqkv_ref, bqkv_ref, wo_ref, vec_ref,
    w1_ref, b1_ref, w2_ref,
    wfc_ref, bfc_ref,
    out_ref,
    *, n_layers, n_head, head_dim, batch, seq_len, d_model,
):
    scale = 1.0 / math.sqrt(head_dim)
    n_rows = batch * seq_len

    # whole batch as one (B*S, nInputs) slab
    x2 = x_ref[...].reshape(n_rows, x_ref.shape[-1])

    # input projection + positional encoding (broadcast pos over batch in 3-D)
    h = jnp.dot(x2, wp_ref[...], preferred_element_type=jnp.float32) + bp_ref[...]
    h = (h.reshape(batch, seq_len, d_model) + pos_ref[...]).reshape(n_rows, d_model)

    for l in range(n_layers):
        vl = vec_ref[l]                                   # (6, D): bo,g1,be1,b2,g2,be2

        # ---- fused Q/K/V projection: one matmul per layer ----
        qkv = jnp.dot(h, wqkv_ref[l], preferred_element_type=jnp.float32) + bqkv_ref[l]
        qkv3 = qkv.reshape(batch, seq_len, 3 * d_model)

        # ---- multi-head self-attention, batched over the batch dim ----
        ctx_heads = []
        for hh in range(n_head):
            lo = hh * head_dim
            q_h = qkv3[:, :, lo:lo + head_dim]                                 # (B,S,hd)
            k_h = qkv3[:, :, d_model + lo:d_model + lo + head_dim]
            v_h = qkv3[:, :, 2 * d_model + lo:2 * d_model + lo + head_dim]
            sc = jnp.einsum('bqd,bkd->bqk', q_h, k_h,
                            preferred_element_type=jnp.float32) * scale
            p = _softmax_last(sc, approx=True)                                 # (B,S,S)
            ctx = jnp.einsum('bqk,bkd->bqd', p, v_h,
                             preferred_element_type=jnp.float32)               # (B,S,hd)
            ctx_heads.append(ctx.reshape(n_rows, head_dim))
        attn = jnp.concatenate(ctx_heads, axis=-1)                             # (B*S,D)
        attn = jnp.dot(attn, wo_ref[l], preferred_element_type=jnp.float32) + vl[0:1, :]

        # TODO(synk): dropout omitted (inference / eval semantics).
        h = _layernorm(h + attn, vl[1:2, :], vl[2:3, :])

        # ---- feed-forward ----
        f = jnp.dot(h, w1_ref[l], preferred_element_type=jnp.float32) + b1_ref[l]
        f = jnp.maximum(f, 0.0)                                                # ReLU
        f = jnp.dot(f, w2_ref[l], preferred_element_type=jnp.float32) + vl[3:4, :]
        h = _layernorm(h + f, vl[4:5, :], vl[5:6, :])

    # last timestep of each sequence: rows S-1, 2S-1, ...
    last_rows = [h[b * seq_len + seq_len - 1:b * seq_len + seq_len, :] for b in range(batch)]
    h_last = jnp.concatenate(last_rows, axis=0)                                # (B, D)

    # fc (padded to 128 lanes; padded bias = -1e30 -> softmax gives exact 0 there)
    logits = jnp.dot(h_last, wfc_ref[...], preferred_element_type=jnp.float32) + bfc_ref[...]
    out_ref[...] = _softmax_last(logits, approx=False)                         # (B, 128)


# ------------------------------ wrapper ---------------------------------------
def time_series_transformer(x, params):
    B, S, _ = x.shape

    # pack parameters into a few lane-dense slabs (fewer DMAs / BlockSpecs)
    wqkv = jnp.concatenate([params["wq"], params["wk"], params["wv"]], axis=-1)   # (L,D,3D)
    bqkv = jnp.concatenate([params["bq"], params["bk"], params["bv"]], axis=-1)   # (L,1,3D)
    vec = jnp.concatenate([params["bo"], params["g1"], params["be1"],
                           params["b2"], params["g2"], params["be2"]], axis=1)    # (L,6,D)
    wfc_pad = jnp.zeros((D_MODEL, N_OUT_PAD), jnp.float32).at[:, :N_OUTPUT].set(params["wfc"])
    bfc_pad = jnp.full((1, N_OUT_PAD), -1e30, jnp.float32).at[:, :N_OUTPUT].set(params["bfc"])

    kernel = functools.partial(
        transformer_kernel,
        n_layers=N_LAYERS, n_head=N_HEAD, head_dim=HEAD_DIM,
        batch=B, seq_len=S, d_model=D_MODEL,
    )

    out = pl.pallas_call(
        kernel,
        out_shape=jax.ShapeDtypeStruct((B, N_OUT_PAD), jnp.float32),
    )(x, params["pos"], params["wp"], params["bp"],
      wqkv, bqkv, params["wo"], vec,
      params["w1"], params["b1"], params["w2"],
      wfc_pad, bfc_pad)

    return out[:, :N_OUTPUT]


# -------------------------- parameter construction ---------------------------
def make_pos_encoding(d_model, max_length):
    position = jnp.arange(0, max_length, dtype=jnp.float32)[:, None]
    div_term = jnp.exp(
        jnp.arange(0, d_model, 2, dtype=jnp.float32) * -(math.log(10000.0) / d_model))
    pe_sin = jnp.sin(position * div_term)
    pe_cos = jnp.cos(position * div_term)
    pe = jnp.stack([pe_sin, pe_cos], axis=-1).reshape(max_length, d_model)
    return pe                                               # even cols=sin, odd cols=cos


def make_params(key, seq_len):
    # NOTE: weights are in (in_features, out_features) layout; real PyTorch
    # checkpoints (out,in + packed in_proj) must be transposed/split before use.
    ks = jax.random.split(key, 32)
    s = 0.1

    def rnd(i, shape):
        return s * jax.random.normal(ks[i], shape, dtype=jnp.float32)

    params = dict(
        pos=make_pos_encoding(D_MODEL, 500)[:seq_len, :],            # (S, dModel)
        wp=rnd(0, (N_INPUTS, D_MODEL)), bp=rnd(1, (1, D_MODEL)),
        wq=rnd(2, (N_LAYERS, D_MODEL, D_MODEL)), bq=rnd(3, (N_LAYERS, 1, D_MODEL)),
        wk=rnd(4, (N_LAYERS, D_MODEL, D_MODEL)), bk=rnd(5, (N_LAYERS, 1, D_MODEL)),
        wv=rnd(6, (N_LAYERS, D_MODEL, D_MODEL)), bv=rnd(7, (N_LAYERS, 1, D_MODEL)),
        wo=rnd(8, (N_LAYERS, D_MODEL, D_MODEL)), bo=rnd(9, (N_LAYERS, 1, D_MODEL)),
        g1=jnp.ones((N_LAYERS, 1, D_MODEL), jnp.float32),
        be1=jnp.zeros((N_LAYERS, 1, D_MODEL), jnp.float32),
        w1=rnd(10, (N_LAYERS, D_MODEL, DIM_FF)), b1=rnd(11, (N_LAYERS, 1, DIM_FF)),
        w2=rnd(12, (N_LAYERS, DIM_FF, D_MODEL)), b2=rnd(13, (N_LAYERS, 1, D_MODEL)),
        g2=jnp.ones((N_LAYERS, 1, D_MODEL), jnp.float32),
        be2=jnp.zeros((N_LAYERS, 1, D_MODEL), jnp.float32),
        wfc=rnd(14, (D_MODEL, N_OUTPUT)), bfc=rnd(15, (1, N_OUTPUT)),
    )
    return params


# ------------------------------ main -----------------------------------------
if __name__ == "__main__":
    key = jax.random.PRNGKey(0)
    x = jax.random.normal(key, (BATCH, SEQ, N_INPUTS), dtype=jnp.float32)
    params = make_params(jax.random.PRNGKey(42), SEQ)

    out = time_series_transformer(x, params)
    out = jax.block_until_ready(out)

    assert out.shape == (BATCH, N_OUTPUT)
    assert bool(jnp.all(jnp.isfinite(out)))
    assert bool(jnp.allclose(jnp.sum(out, axis=1), 1.0, atol=1e-4))
    print("KERNEL_OK")
</pallas_src>

<mosaic_0001>
module attributes {stable_mosaic.version = 11 : i64} {
  func.func @transformer_kernel(%arg0: memref<2x8x4xf32, #tpu.memory_space<vmem>>, %arg1: memref<8x32xf32, #tpu.memory_space<vmem>>, %arg2: memref<4x32xf32, #tpu.memory_space<vmem>>, %arg3: memref<1x32xf32, #tpu.memory_space<vmem>>, %arg4: memref<2x32x96xf32, #tpu.memory_space<vmem>>, %arg5: memref<2x1x96xf32, #tpu.memory_space<vmem>>, %arg6: memref<2x32x32xf32, #tpu.memory_space<vmem>>, %arg7: memref<2x6x32xf32, #tpu.memory_space<vmem>>, %arg8: memref<2x32x64xf32, #tpu.memory_space<vmem>>, %arg9: memref<2x1x64xf32, #tpu.memory_space<vmem>>, %arg10: memref<2x64x32xf32, #tpu.memory_space<vmem>>, %arg11: memref<32x128xf32, #tpu.memory_space<vmem>>, %arg12: memref<1x128xf32, #tpu.memory_space<vmem>>, %arg13: memref<2x128xf32, #tpu.memory_space<vmem>>) attributes {dimension_semantics = [], scalar_prefetch = 0 : i64, scratch_operands = 0 : i64, tpu.core_type = #tpu.core_type<tc>} {
    %c0 = arith.constant 0 : index
    %c0_0 = arith.constant 0 : index
    %c0_1 = arith.constant 0 : index
    %0 = vector.load %arg0[%c0, %c0_0, %c0_1] : memref<2x8x4xf32, #tpu.memory_space<vmem>>, vector<2x8x4xf32>
    %1 = vector.shape_cast %0 : vector<2x8x4xf32> to vector<16x4xf32>
    %c0_2 = arith.constant 0 : index
    %c0_3 = arith.constant 0 : index
    %2 = vector.load %arg2[%c0_2, %c0_3] : memref<4x32xf32, #tpu.memory_space<vmem>>, vector<4x32xf32>
    %cst = arith.constant dense<0.000000e+00> : vector<16x32xf32>
    %3 = tpu.matmul %1, %2, %cst {dimension_numbers = #tpu.dot_dimension_numbers<[1], [0], [0], [1], [0, 0, 1, 1], [], []>} : vector<16x4xf32>, vector<4x32xf32>, vector<16x32xf32> -> vector<16x32xf32>
    %c0_4 = arith.constant 0 : index
    %c0_5 = arith.constant 0 : index
    %4 = vector.load %arg3[%c0_4, %c0_5] : memref<1x32xf32, #tpu.memory_space<vmem>>, vector<1x32xf32>
    %5 = vector.broadcast %4 : vector<1x32xf32> to vector<16x32xf32>
    %6 = arith.addf %3, %5 : vector<16x32xf32>
    %7 = vector.shape_cast %6 : vector<16x32xf32> to vector<2x8x32xf32>
    %c0_6 = arith.constant 0 : index
    %c0_7 = arith.constant 0 : index
    %8 = vector.load %arg1[%c0_6, %c0_7] : memref<8x32xf32, #tpu.memory_space<vmem>>, vector<8x32xf32>
    %9 = vector.shape_cast %8 : vector<8x32xf32> to vector<1x8x32xf32>
    %10 = vector.broadcast %9 : vector<1x8x32xf32> to vector<2x8x32xf32>
    %11 = arith.addf %7, %10 : vector<2x8x32xf32>
    %12 = vector.shape_cast %11 : vector<2x8x32xf32> to vector<16x32xf32>
    %c0_8 = arith.constant 0 : index
    %c0_9 = arith.constant 0 : index
    %c0_10 = arith.constant 0 : index
    %13 = vector.load %arg7[%c0_8, %c0_9, %c0_10] : memref<2x6x32xf32, #tpu.memory_space<vmem>>, vector<1x6x32xf32>
    %14 = vector.shape_cast %13 : vector<1x6x32xf32> to vector<6x32xf32>
    %c0_11 = arith.constant 0 : index
    %c0_12 = arith.constant 0 : index
    %c0_13 = arith.constant 0 : index
    %15 = vector.load %arg4[%c0_11, %c0_12, %c0_13] : memref<2x32x96xf32, #tpu.memory_space<vmem>>, vector<1x32x96xf32>
    %16 = vector.shape_cast %15 : vector<1x32x96xf32> to vector<32x96xf32>
    %cst_14 = arith.constant dense<0.000000e+00> : vector<16x96xf32>
    %17 = tpu.matmul %12, %16, %cst_14 {dimension_numbers = #tpu.dot_dimension_numbers<[1], [0], [0], [1], [0, 0, 1, 1], [], []>} : vector<16x32xf32>, vector<32x96xf32>, vector<16x96xf32> -> vector<16x96xf32>
    %c0_15 = arith.constant 0 : index
    %c0_16 = arith.constant 0 : index
    %c0_17 = arith.constant 0 : index
    %18 = vector.load %arg5[%c0_15, %c0_16, %c0_17] : memref<2x1x96xf32, #tpu.memory_space<vmem>>, vector<1x1x96xf32>
    %19 = vector.shape_cast %18 : vector<1x1x96xf32> to vector<1x96xf32>
    %20 = vector.broadcast %19 : vector<1x96xf32> to vector<16x96xf32>
    %21 = arith.addf %17, %20 : vector<16x96xf32>
    %22 = vector.shape_cast %21 : vector<16x96xf32> to vector<2x8x96xf32>
    %23 = vector.extract_strided_slice %22 {offsets = [0, 0, 0], sizes = [2, 8, 8], strides = [1, 1, 1]} : vector<2x8x96xf32> to vector<2x8x8xf32>
    %24 = vector.extract_strided_slice %22 {offsets = [0, 0, 32], sizes = [2, 8, 8], strides = [1, 1, 1]} : vector<2x8x96xf32> to vector<2x8x8xf32>
    %25 = vector.extract_strided_slice %22 {offsets = [0, 0, 64], sizes = [2, 8, 8], strides = [1, 1, 1]} : vector<2x8x96xf32> to vector<2x8x8xf32>
    "tpu.trace_start"() <{level = 10 : i32, message = "bqd,bkd->bqk"}> : () -> ()
    %cst_18 = arith.constant dense<0.000000e+00> : vector<2x8x8xf32>
    %26 = tpu.matmul %23, %24, %cst_18 {dimension_numbers = #tpu.dot_dimension_numbers<[2], [2], [1], [1], [0, 0, 0, 1, 1, 1], [0], [0]>} : vector<2x8x8xf32>, vector<2x8x8xf32>, vector<2x8x8xf32> -> vector<2x8x8xf32>
    "tpu.trace_stop"() : () -> ()
    %cst_19 = arith.constant 0.353553385 : f32
    %27 = vector.broadcast %cst_19 : f32 to vector<2x8x8xf32>
    %28 = arith.mulf %26, %27 : vector<2x8x8xf32>
    %cst_20 = arith.constant dense<0xFF800000> : vector<2x8xf32>
    %29 = vector.multi_reduction <maximumf>, %28, %cst_20 [2] : vector<2x8x8xf32> to vector<2x8xf32>
    %30 = vector.shape_cast %29 : vector<2x8xf32> to vector<2x8x1xf32>
    %31 = vector.broadcast %30 : vector<2x8x1xf32> to vector<2x8x8xf32>
    %32 = arith.subf %28, %31 : vector<2x8x8xf32>
    %33 = math.exp %32 : vector<2x8x8xf32>
    %cst_21 = arith.constant dense<0.000000e+00> : vector<2x8xf32>
    %34 = vector.multi_reduction <add>, %33, %cst_21 [2] : vector<2x8x8xf32> to vector<2x8xf32>
    %35 = vector.shape_cast %34 : vector<2x8xf32> to vector<2x8x1xf32>
    %36 = tpu.reciprocal %35 {approx = true} : vector<2x8x1xf32> -> vector<2x8x1xf32>
    %37 = vector.broadcast %36 : vector<2x8x1xf32> to vector<2x8x8xf32>
    %38 = arith.mulf %33, %37 : vector<2x8x8xf32>
    "tpu.trace_start"() <{level = 10 : i32, message = "bqk,bkd->bqd"}> : () -> ()
    %cst_22 = arith.constant dense<0.000000e+00> : vector<2x8x8xf32>
    %39 = tpu.matmul %38, %25, %cst_22 {dimension_numbers = #tpu.dot_dimension_numbers<[2], [1], [1], [2], [0, 0, 0, 1, 1, 2], [0], [0]>} : vector<2x8x8xf32>, vector<2x8x8xf32>, vector<2x8x8xf32> -> vector<2x8x8xf32>
    "tpu.trace_stop"() : () -> ()
    %40 = vector.shape_cast %39 : vector<2x8x8xf32> to vector<16x8xf32>
    %41 = vector.extract_strided_slice %22 {offsets = [0, 0, 8], sizes = [2, 8, 8], strides = [1, 1, 1]} : vector<2x8x96xf32> to vector<2x8x8xf32>
    %42 = vector.extract_strided_slice %22 {offsets = [0, 0, 40], sizes = [2, 8, 8], strides = [1, 1, 1]} : vector<2x8x96xf32> to vector<2x8x8xf32>
    %43 = vector.extract_strided_slice %22 {offsets = [0, 0, 72], sizes = [2, 8, 8], strides = [1, 1, 1]} : vector<2x8x96xf32> to vector<2x8x8xf32>
    "tpu.trace_start"() <{level = 10 : i32, message = "bqd,bkd->bqk"}> : () -> ()
    %cst_23 = arith.constant dense<0.000000e+00> : vector<2x8x8xf32>
    %44 = tpu.matmul %41, %42, %cst_23 {dimension_numbers = #tpu.dot_dimension_numbers<[2], [2], [1], [1], [0, 0, 0, 1, 1, 1], [0], [0]>} : vector<2x8x8xf32>, vector<2x8x8xf32>, vector<2x8x8xf32> -> vector<2x8x8xf32>
    "tpu.trace_stop"() : () -> ()
    %cst_24 = arith.constant 0.353553385 : f32
    %45 = vector.broadcast %cst_24 : f32 to vector<2x8x8xf32>
    %46 = arith.mulf %44, %45 : vector<2x8x8xf32>
    %cst_25 = arith.constant dense<0xFF800000> : vector<2x8xf32>
    %47 = vector.multi_reduction <maximumf>, %46, %cst_25 [2] : vector<2x8x8xf32> to vector<2x8xf32>
    %48 = vector.shape_cast %47 : vector<2x8xf32> to vector<2x8x1xf32>
    %49 = vector.broadcast %48 : vector<2x8x1xf32> to vector<2x8x8xf32>
    %50 = arith.subf %46, %49 : vector<2x8x8xf32>
    %51 = math.exp %50 : vector<2x8x8xf32>
    %cst_26 = arith.constant dense<0.000000e+00> : vector<2x8xf32>
    %52 = vector.multi_reduction <add>, %51, %cst_26 [2] : vector<2x8x8xf32> to vector<2x8xf32>
    %53 = vector.shape_cast %52 : vector<2x8xf32> to vector<2x8x1xf32>
    %54 = tpu.reciprocal %53 {approx = true} : vector<2x8x1xf32> -> vector<2x8x1xf32>
    %55 = vector.broadcast %54 : vector<2x8x1xf32> to vector<2x8x8xf32>
    %56 = arith.mulf %51, %55 : vector<2x8x8xf32>
    "tpu.trace_start"() <{level = 10 : i32, message = "bqk,bkd->bqd"}> : () -> ()
    %cst_27 = arith.constant dense<0.000000e+00> : vector<2x8x8xf32>
    %57 = tpu.matmul %56, %43, %cst_27 {dimension_numbers = #tpu.dot_dimension_numbers<[2], [1], [1], [2], [0, 0, 0, 1, 1, 2], [0], [0]>} : vector<2x8x8xf32>, vector<2x8x8xf32>, vector<2x8x8xf32> -> vector<2x8x8xf32>
    "tpu.trace_stop"() : () -> ()
    %58 = vector.shape_cast %57 : vector<2x8x8xf32> to vector<16x8xf32>
    %59 = vector.extract_strided_slice %22 {offsets = [0, 0, 16], sizes = [2, 8, 8], strides = [1, 1, 1]} : vector<2x8x96xf32> to vector<2x8x8xf32>
    %60 = vector.extract_strided_slice %22 {offsets = [0, 0, 48], sizes = [2, 8, 8], strides = [1, 1, 1]} : vector<2x8x96xf32> to vector<2x8x8xf32>
    %61 = vector.extract_strided_slice %22 {offsets = [0, 0, 80], sizes = [2, 8, 8], strides = [1, 1, 1]} : vector<2x8x96xf32> to vector<2x8x8xf32>
    "tpu.trace_start"() <{level = 10 : i32, message = "bqd,bkd->bqk"}> : () -> ()
    %cst_28 = arith.constant dense<0.000000e+00> : vector<2x8x8xf32>
    %62 = tpu.matmul %59, %60, %cst_28 {dimension_numbers = #tpu.dot_dimension_numbers<[2], [2], [1], [1], [0, 0, 0, 1, 1, 1], [0], [0]>} : vector<2x8x8xf32>, vector<2x8x8xf32>, vector<2x8x8xf32> -> vector<2x8x8xf32>
    "tpu.trace_stop"() : () -> ()
    %cst_29 = arith.constant 0.353553385 : f32
    %63 = vector.broadcast %cst_29 : f32 to vector<2x8x8xf32>
    %64 = arith.mulf %62, %63 : vector<2x8x8xf32>
    %cst_30 = arith.constant dense<0xFF800000> : vector<2x8xf32>
    %65 = vector.multi_reduction <maximumf>, %64, %cst_30 [2] : vector<2x8x8xf32> to vector<2x8xf32>
    %66 = vector.shape_cast %65 : vector<2x8xf32> to vector<2x8x1xf32>
    %67 = vector.broadcast %66 : vector<2x8x1xf32> to vector<2x8x8xf32>
    %68 = arith.subf %64, %67 : vector<2x8x8xf32>
    %69 = math.exp %68 : vector<2x8x8xf32>
    %cst_31 = arith.constant dense<0.000000e+00> : vector<2x8xf32>
    %70 = vector.multi_reduction <add>, %69, %cst_31 [2] : vector<2x8x8xf32> to vector<2x8xf32>
    %71 = vector.shape_cast %70 : vector<2x8xf32> to vector<2x8x1xf32>
    %72 = tpu.reciprocal %71 {approx = true} : vector<2x8x1xf32> -> vector<2x8x1xf32>
    %73 = vector.broadcast %72 : vector<2x8x1xf32> to vector<2x8x8xf32>
    %74 = arith.mulf %69, %73 : vector<2x8x8xf32>
    "tpu.trace_start"() <{level = 10 : i32, message = "bqk,bkd->bqd"}> : () -> ()
    %cst_32 = arith.constant dense<0.000000e+00> : vector<2x8x8xf32>
    %75 = tpu.matmul %74, %61, %cst_32 {dimension_numbers = #tpu.dot_dimension_numbers<[2], [1], [1], [2], [0, 0, 0, 1, 1, 2], [0], [0]>} : vector<2x8x8xf32>, vector<2x8x8xf32>, vector<2x8x8xf32> -> vector<2x8x8xf32>
    "tpu.trace_stop"() : () -> ()
    %76 = vector.shape_cast %75 : vector<2x8x8xf32> to vector<16x8xf32>
    %77 = vector.extract_strided_slice %22 {offsets = [0, 0, 24], sizes = [2, 8, 8], strides = [1, 1, 1]} : vector<2x8x96xf32> to vector<2x8x8xf32>
    %78 = vector.extract_strided_slice %22 {offsets = [0, 0, 56], sizes = [2, 8, 8], strides = [1, 1, 1]} : vector<2x8x96xf32> to vector<2x8x8xf32>
    %79 = vector.extract_strided_slice %22 {offsets = [0, 0, 88], sizes = [2, 8, 8], strides = [1, 1, 1]} : vector<2x8x96xf32> to vector<2x8x8xf32>
    "tpu.trace_start"() <{level = 10 : i32, message = "bqd,bkd->bqk"}> : () -> ()
    %cst_33 = arith.constant dense<0.000000e+00> : vector<2x8x8xf32>
    %80 = tpu.matmul %77, %78, %cst_33 {dimension_numbers = #tpu.dot_dimension_numbers<[2], [2], [1], [1], [0, 0, 0, 1, 1, 1], [0], [0]>} : vector<2x8x8xf32>, vector<2x8x8xf32>, vector<2x8x8xf32> -> vector<2x8x8xf32>
    "tpu.trace_stop"() : () -> ()
    %cst_34 = arith.constant 0.353553385 : f32
    %81 = vector.broadcast %cst_34 : f32 to vector<2x8x8xf32>
    %82 = arith.mulf %80, %81 : vector<2x8x8xf32>
    %cst_35 = arith.constant dense<0xFF800000> : vector<2x8xf32>
    %83 = vector.multi_reduction <maximumf>, %82, %cst_35 [2] : vector<2x8x8xf32> to vector<2x8xf32>
    %84 = vector.shape_cast %83 : vector<2x8xf32> to vector<2x8x1xf32>
    %85 = vector.broadcast %84 : vector<2x8x1xf32> to vector<2x8x8xf32>
    %86 = arith.subf %82, %85 : vector<2x8x8xf32>
    %87 = math.exp %86 : vector<2x8x8xf32>
    %cst_36 = arith.constant dense<0.000000e+00> : vector<2x8xf32>
    %88 = vector.multi_reduction <add>, %87, %cst_36 [2] : vector<2x8x8xf32> to vector<2x8xf32>
    %89 = vector.shape_cast %88 : vector<2x8xf32> to vector<2x8x1xf32>
    %90 = tpu.reciprocal %89 {approx = true} : vector<2x8x1xf32> -> vector<2x8x1xf32>
    %91 = vector.broadcast %90 : vector<2x8x1xf32> to vector<2x8x8xf32>
    %92 = arith.mulf %87, %91 : vector<2x8x8xf32>
    "tpu.trace_start"() <{level = 10 : i32, message = "bqk,bkd->bqd"}> : () -> ()
    %cst_37 = arith.constant dense<0.000000e+00> : vector<2x8x8xf32>
    %93 = tpu.matmul %92, %79, %cst_37 {dimension_numbers = #tpu.dot_dimension_numbers<[2], [1], [1], [2], [0, 0, 0, 1, 1, 2], [0], [0]>} : vector<2x8x8xf32>, vector<2x8x8xf32>, vector<2x8x8xf32> -> vector<2x8x8xf32>
    "tpu.trace_stop"() : () -> ()
    %94 = vector.shape_cast %93 : vector<2x8x8xf32> to vector<16x8xf32>
    %95 = tpu.concatenate %40, %58, %76, %94 in 1 : vector<16x8xf32>, vector<16x8xf32>, vector<16x8xf32>, vector<16x8xf32> -> vector<16x32xf32>
    %c0_38 = arith.constant 0 : index
    %c0_39 = arith.constant 0 : index
    %c0_40 = arith.constant 0 : index
    %96 = vector.load %arg6[%c0_38, %c0_39, %c0_40] : memref<2x32x32xf32, #tpu.memory_space<vmem>>, vector<1x32x32xf32>
    %97 = vector.shape_cast %96 : vector<1x32x32xf32> to vector<32x32xf32>
    %cst_41 = arith.constant dense<0.000000e+00> : vector<16x32xf32>
    %98 = tpu.matmul %95, %97, %cst_41 {dimension_numbers = #tpu.dot_dimension_numbers<[1], [0], [0], [1], [0, 0, 1, 1], [], []>} : vector<16x32xf32>, vector<32x32xf32>, vector<16x32xf32> -> vector<16x32xf32>
    %99 = vector.extract_strided_slice %14 {offsets = [0, 0], sizes = [1, 32], strides = [1, 1]} : vector<6x32xf32> to vector<1x32xf32>
    %100 = vector.broadcast %99 : vector<1x32xf32> to vector<16x32xf32>
    %101 = arith.addf %98, %100 : vector<16x32xf32>
    %102 = arith.addf %12, %101 : vector<16x32xf32>
    %103 = vector.extract_strided_slice %14 {offsets = [1, 0], sizes = [1, 32], strides = [1, 1]} : vector<6x32xf32> to vector<1x32xf32>
    %104 = vector.extract_strided_slice %14 {offsets = [2, 0], sizes = [1, 32], strides = [1, 1]} : vector<6x32xf32> to vector<1x32xf32>
    %cst_42 = arith.constant dense<0.000000e+00> : vector<16xf32>
    %105 = vector.multi_reduction <add>, %102, %cst_42 [1] : vector<16x32xf32> to vector<16xf32>
    %106 = vector.shape_cast %105 : vector<16xf32> to vector<16x1xf32>
    %cst_43 = arith.constant 3.200000e+01 : f32
    %107 = vector.broadcast %cst_43 : f32 to vector<16x1xf32>
    %108 = arith.divf %106, %107 : vector<16x1xf32>
    %109 = vector.broadcast %108 : vector<16x1xf32> to vector<16x32xf32>
    %110 = arith.subf %102, %109 : vector<16x32xf32>
    %111 = arith.mulf %110, %110 : vector<16x32xf32>
    %cst_44 = arith.constant dense<0.000000e+00> : vector<16xf32>
    %112 = vector.multi_reduction <add>, %111, %cst_44 [1] : vector<16x32xf32> to vector<16xf32>
    %113 = vector.shape_cast %112 : vector<16xf32> to vector<16x1xf32>
    %cst_45 = arith.constant 3.200000e+01 : f32
    %114 = vector.broadcast %cst_45 : f32 to vector<16x1xf32>
    %115 = arith.divf %113, %114 : vector<16x1xf32>
    %cst_46 = arith.constant 9.99999974E-6 : f32
    %116 = vector.broadcast %cst_46 : f32 to vector<16x1xf32>
    %117 = arith.addf %115, %116 : vector<16x1xf32>
    %118 = math.rsqrt %117 : vector<16x1xf32>
    %119 = vector.broadcast %118 : vector<16x1xf32> to vector<16x32xf32>
    %120 = arith.mulf %110, %119 : vector<16x32xf32>
    %121 = vector.broadcast %103 : vector<1x32xf32> to vector<16x32xf32>
    %122 = arith.mulf %120, %121 : vector<16x32xf32>
    %123 = vector.broadcast %104 : vector<1x32xf32> to vector<16x32xf32>
    %124 = arith.addf %122, %123 : vector<16x32xf32>
    %c0_47 = arith.constant 0 : index
    %c0_48 = arith.constant 0 : index
    %c0_49 = arith.constant 0 : index
    %125 = vector.load %arg8[%c0_47, %c0_48, %c0_49] : memref<2x32x64xf32, #tpu.memory_space<vmem>>, vector<1x32x64xf32>
    %126 = vector.shape_cast %125 : vector<1x32x64xf32> to vector<32x64xf32>
    %cst_50 = arith.constant dense<0.000000e+00> : vector<16x64xf32>
    %127 = tpu.matmul %124, %126, %cst_50 {dimension_numbers = #tpu.dot_dimension_numbers<[1], [0], [0], [1], [0, 0, 1, 1], [], []>} : vector<16x32xf32>, vector<32x64xf32>, vector<16x64xf32> -> vector<16x64xf32>
    %c0_51 = arith.constant 0 : index
    %c0_52 = arith.constant 0 : index
    %c0_53 = arith.constant 0 : index
    %128 = vector.load %arg9[%c0_51, %c0_52, %c0_53] : memref<2x1x64xf32, #tpu.memory_space<vmem>>, vector<1x1x64xf32>
    %129 = vector.shape_cast %128 : vector<1x1x64xf32> to vector<1x64xf32>
    %130 = vector.broadcast %129 : vector<1x64xf32> to vector<16x64xf32>
    %131 = arith.addf %127, %130 : vector<16x64xf32>
    %cst_54 = arith.constant 0.000000e+00 : f32
    %132 = vector.broadcast %cst_54 : f32 to vector<16x64xf32>
    %133 = arith.maximumf %131, %132 : vector<16x64xf32>
    %c0_55 = arith.constant 0 : index
    %c0_56 = arith.constant 0 : index
    %c0_57 = arith.constant 0 : index
    %134 = vector.load %arg10[%c0_55, %c0_56, %c0_57] : memref<2x64x32xf32, #tpu.memory_space<vmem>>, vector<1x64x32xf32>
    %135 = vector.shape_cast %134 : vector<1x64x32xf32> to vector<64x32xf32>
    %cst_58 = arith.constant dense<0.000000e+00> : vector<16x32xf32>
    %136 = tpu.matmul %133, %135, %cst_58 {dimension_numbers = #tpu.dot_dimension_numbers<[1], [0], [0], [1], [0, 0, 1, 1], [], []>} : vector<16x64xf32>, vector<64x32xf32>, vector<16x32xf32> -> vector<16x32xf32>
    %137 = vector.extract_strided_slice %14 {offsets = [3, 0], sizes = [1, 32], strides = [1, 1]} : vector<6x32xf32> to vector<1x32xf32>
    %138 = vector.broadcast %137 : vector<1x32xf32> to vector<16x32xf32>
    %139 = arith.addf %136, %138 : vector<16x32xf32>
    %140 = arith.addf %124, %139 : vector<16x32xf32>
    %141 = vector.extract_strided_slice %14 {offsets = [4, 0], sizes = [1, 32], strides = [1, 1]} : vector<6x32xf32> to vector<1x32xf32>
    %142 = vector.extract_strided_slice %14 {offsets = [5, 0], sizes = [1, 32], strides = [1, 1]} : vector<6x32xf32> to vector<1x32xf32>
    %cst_59 = arith.constant dense<0.000000e+00> : vector<16xf32>
    %143 = vector.multi_reduction <add>, %140, %cst_59 [1] : vector<16x32xf32> to vector<16xf32>
    %144 = vector.shape_cast %143 : vector<16xf32> to vector<16x1xf32>
    %cst_60 = arith.constant 3.200000e+01 : f32
    %145 = vector.broadcast %cst_60 : f32 to vector<16x1xf32>
    %146 = arith.divf %144, %145 : vector<16x1xf32>
    %147 = vector.broadcast %146 : vector<16x1xf32> to vector<16x32xf32>
    %148 = arith.subf %140, %147 : vector<16x32xf32>
    %149 = arith.mulf %148, %148 : vector<16x32xf32>
    %cst_61 = arith.constant dense<0.000000e+00> : vector<16xf32>
    %150 = vector.multi_reduction <add>, %149, %cst_61 [1] : vector<16x32xf32> to vector<16xf32>
    %151 = vector.shape_cast %150 : vector<16xf32> to vector<16x1xf32>
    %cst_62 = arith.constant 3.200000e+01 : f32
    %152 = vector.broadcast %cst_62 : f32 to vector<16x1xf32>
    %153 = arith.divf %151, %152 : vector<16x1xf32>
    %cst_63 = arith.constant 9.99999974E-6 : f32
    %154 = vector.broadcast %cst_63 : f32 to vector<16x1xf32>
    %155 = arith.addf %153, %154 : vector<16x1xf32>
    %156 = math.rsqrt %155 : vector<16x1xf32>
    %157 = vector.broadcast %156 : vector<16x1xf32> to vector<16x32xf32>
    %158 = arith.mulf %148, %157 : vector<16x32xf32>
    %159 = vector.broadcast %141 : vector<1x32xf32> to vector<16x32xf32>
    %160 = arith.mulf %158, %159 : vector<16x32xf32>
    %161 = vector.broadcast %142 : vector<1x32xf32> to vector<16x32xf32>
    %162 = arith.addf %160, %161 : vector<16x32xf32>
    %c1 = arith.constant 1 : index
    %c0_64 = arith.constant 0 : index
    %c0_65 = arith.constant 0 : index
    %163 = vector.load %arg7[%c1, %c0_64, %c0_65] : memref<2x6x32xf32, #tpu.memory_space<vmem>>, vector<1x6x32xf32>
    %164 = vector.shape_cast %163 : vector<1x6x32xf32> to vector<6x32xf32>
    %c1_66 = arith.constant 1 : index
    %c0_67 = arith.constant 0 : index
    %c0_68 = arith.constant 0 : index
    %165 = vector.load %arg4[%c1_66, %c0_67, %c0_68] : memref<2x32x96xf32, #tpu.memory_space<vmem>>, vector<1x32x96xf32>
    %166 = vector.shape_cast %165 : vector<1x32x96xf32> to vector<32x96xf32>
    %cst_69 = arith.constant dense<0.000000e+00> : vector<16x96xf32>
    %167 = tpu.matmul %162, %166, %cst_69 {dimension_numbers = #tpu.dot_dimension_numbers<[1], [0], [0], [1], [0, 0, 1, 1], [], []>} : vector<16x32xf32>, vector<32x96xf32>, vector<16x96xf32> -> vector<16x96xf32>
    %c1_70 = arith.constant 1 : index
    %c0_71 = arith.constant 0 : index
    %c0_72 = arith.constant 0 : index
    %168 = vector.load %arg5[%c1_70, %c0_71, %c0_72] : memref<2x1x96xf32, #tpu.memory_space<vmem>>, vector<1x1x96xf32>
    %169 = vector.shape_cast %168 : vector<1x1x96xf32> to vector<1x96xf32>
    %170 = vector.broadcast %169 : vector<1x96xf32> to vector<16x96xf32>
    %171 = arith.addf %167, %170 : vector<16x96xf32>
    %172 = vector.shape_cast %171 : vector<16x96xf32> to vector<2x8x96xf32>
    %173 = vector.extract_strided_slice %172 {offsets = [0, 0, 0], sizes = [2, 8, 8], strides = [1, 1, 1]} : vector<2x8x96xf32> to vector<2x8x8xf32>
    %174 = vector.extract_strided_slice %172 {offsets = [0, 0, 32], sizes = [2, 8, 8], strides = [1, 1, 1]} : vector<2x8x96xf32> to vector<2x8x8xf32>
    %175 = vector.extract_strided_slice %172 {offsets = [0, 0, 64], sizes = [2, 8, 8], strides = [1, 1, 1]} : vector<2x8x96xf32> to vector<2x8x8xf32>
    "tpu.trace_start"() <{level = 10 : i32, message = "bqd,bkd->bqk"}> : () -> ()
    %cst_73 = arith.constant dense<0.000000e+00> : vector<2x8x8xf32>
    %176 = tpu.matmul %173, %174, %cst_73 {dimension_numbers = #tpu.dot_dimension_numbers<[2], [2], [1], [1], [0, 0, 0, 1, 1, 1], [0], [0]>} : vector<2x8x8xf32>, vector<2x8x8xf32>, vector<2x8x8xf32> -> vector<2x8x8xf32>
    "tpu.trace_stop"() : () -> ()
    %cst_74 = arith.constant 0.353553385 : f32
    %177 = vector.broadcast %cst_74 : f32 to vector<2x8x8xf32>
    %178 = arith.mulf %176, %177 : vector<2x8x8xf32>
    %cst_75 = arith.constant dense<0xFF800000> : vector<2x8xf32>
    %179 = vector.multi_reduction <maximumf>, %178, %cst_75 [2] : vector<2x8x8xf32> to vector<2x8xf32>
    %180 = vector.shape_cast %179 : vector<2x8xf32> to vector<2x8x1xf32>
    %181 = vector.broadcast %180 : vector<2x8x1xf32> to vector<2x8x8xf32>
    %182 = arith.subf %178, %181 : vector<2x8x8xf32>
    %183 = math.exp %182 : vector<2x8x8xf32>
    %cst_76 = arith.constant dense<0.000000e+00> : vector<2x8xf32>
    %184 = vector.multi_reduction <add>, %183, %cst_76 [2] : vector<2x8x8xf32> to vector<2x8xf32>
    %185 = vector.shape_cast %184 : vector<2x8xf32> to vector<2x8x1xf32>
    %186 = tpu.reciprocal %185 {approx = true} : vector<2x8x1xf32> -> vector<2x8x1xf32>
    %187 = vector.broadcast %186 : vector<2x8x1xf32> to vector<2x8x8xf32>
    %188 = arith.mulf %183, %187 : vector<2x8x8xf32>
    "tpu.trace_start"() <{level = 10 : i32, message = "bqk,bkd->bqd"}> : () -> ()
    %cst_77 = arith.constant dense<0.000000e+00> : vector<2x8x8xf32>
    %189 = tpu.matmul %188, %175, %cst_77 {dimension_numbers = #tpu.dot_dimension_numbers<[2], [1], [1], [2], [0, 0, 0, 1, 1, 2], [0], [0]>} : vector<2x8x8xf32>, vector<2x8x8xf32>, vector<2x8x8xf32> -> vector<2x8x8xf32>
    "tpu.trace_stop"() : () -> ()
    %190 = vector.shape_cast %189 : vector<2x8x8xf32> to vector<16x8xf32>
    %191 = vector.extract_strided_slice %172 {offsets = [0, 0, 8], sizes = [2, 8, 8], strides = [1, 1, 1]} : vector<2x8x96xf32> to vector<2x8x8xf32>
    %192 = vector.extract_strided_slice %172 {offsets = [0, 0, 40], sizes = [2, 8, 8], strides = [1, 1, 1]} : vector<2x8x96xf32> to vector<2x8x8xf32>
    %193 = vector.extract_strided_slice %172 {offsets = [0, 0, 72], sizes = [2, 8, 8], strides = [1, 1, 1]} : vector<2x8x96xf32> to vector<2x8x8xf32>
    "tpu.trace_start"() <{level = 10 : i32, message = "bqd,bkd->bqk"}> : () -> ()
    %cst_78 = arith.constant dense<0.000000e+00> : vector<2x8x8xf32>
    %194 = tpu.matmul %191, %192, %cst_78 {dimension_numbers = #tpu.dot_dimension_numbers<[2], [2], [1], [1], [0, 0, 0, 1, 1, 1], [0], [0]>} : vector<2x8x8xf32>, vector<2x8x8xf32>, vector<2x8x8xf32> -> vector<2x8x8xf32>
    "tpu.trace_stop"() : () -> ()
    %cst_79 = arith.constant 0.353553385 : f32
    %195 = vector.broadcast %cst_79 : f32 to vector<2x8x8xf32>
    %196 = arith.mulf %194, %195 : vector<2x8x8xf32>
    %cst_80 = arith.constant dense<0xFF800000> : vector<2x8xf32>
    %197 = vector.multi_reduction <maximumf>, %196, %cst_80 [2] : vector<2x8x8xf32> to vector<2x8xf32>
    %198 = vector.shape_cast %197 : vector<2x8xf32> to vector<2x8x1xf32>
    %199 = vector.broadcast %198 : vector<2x8x1xf32> to vector<2x8x8xf32>
    %200 = arith.subf %196, %199 : vector<2x8x8xf32>
    %201 = math.exp %200 : vector<2x8x8xf32>
    %cst_81 = arith.constant dense<0.000000e+00> : vector<2x8xf32>
    %202 = vector.multi_reduction <add>, %201, %cst_81 [2] : vector<2x8x8xf32> to vector<2x8xf32>
    %203 = vector.shape_cast %202 : vector<2x8xf32> to vector<2x8x1xf32>
    %204 = tpu.reciprocal %203 {approx = true} : vector<2x8x1xf32> -> vector<2x8x1xf32>
    %205 = vector.broadcast %204 : vector<2x8x1xf32> to vector<2x8x8xf32>
    %206 = arith.mulf %201, %205 : vector<2x8x8xf32>
    "tpu.trace_start"() <{level = 10 : i32, message = "bqk,bkd->bqd"}> : () -> ()
    %cst_82 = arith.constant dense<0.000000e+00> : vector<2x8x8xf32>
    %207 = tpu.matmul %206, %193, %cst_82 {dimension_numbers = #tpu.dot_dimension_numbers<[2], [1], [1], [2], [0, 0, 0, 1, 1, 2], [0], [0]>} : vector<2x8x8xf32>, vector<2x8x8xf32>, vector<2x8x8xf32> -> vector<2x8x8xf32>
    "tpu.trace_stop"() : () -> ()
    %208 = vector.shape_cast %207 : vector<2x8x8xf32> to vector<16x8xf32>
    %209 = vector.extract_strided_slice %172 {offsets = [0, 0, 16], sizes = [2, 8, 8], strides = [1, 1, 1]} : vector<2x8x96xf32> to vector<2x8x8xf32>
    %210 = vector.extract_strided_slice %172 {offsets = [0, 0, 48], sizes = [2, 8, 8], strides = [1, 1, 1]} : vector<2x8x96xf32> to vector<2x8x8xf32>
    %211 = vector.extract_strided_slice %172 {offsets = [0, 0, 80], sizes = [2, 8, 8], strides = [1, 1, 1]} : vector<2x8x96xf32> to vector<2x8x8xf32>
    "tpu.trace_start"() <{level = 10 : i32, message = "bqd,bkd->bqk"}> : () -> ()
    %cst_83 = arith.constant dense<0.000000e+00> : vector<2x8x8xf32>
    %212 = tpu.matmul %209, %210, %cst_83 {dimension_numbers = #tpu.dot_dimension_numbers<[2], [2], [1], [1], [0, 0, 0, 1, 1, 1], [0], [0]>} : vector<2x8x8xf32>, vector<2x8x8xf32>, vector<2x8x8xf32> -> vector<2x8x8xf32>
    "tpu.trace_stop"() : () -> ()
    %cst_84 = arith.constant 0.353553385 : f32
    %213 = vector.broadcast %cst_84 : f32 to vector<2x8x8xf32>
    %214 = arith.mulf %212, %213 : vector<2x8x8xf32>
    %cst_85 = arith.constant dense<0xFF800000> : vector<2x8xf32>
    %215 = vector.multi_reduction <maximumf>, %214, %cst_85 [2] : vector<2x8x8xf32> to vector<2x8xf32>
    %216 = vector.shape_cast %215 : vector<2x8xf32> to vector<2x8x1xf32>
    %217 = vector.broadcast %216 : vector<2x8x1xf32> to vector<2x8x8xf32>
    %218 = arith.subf %214, %217 : vector<2x8x8xf32>
    %219 = math.exp %218 : vector<2x8x8xf32>
    %cst_86 = arith.constant dense<0.000000e+00> : vector<2x8xf32>
    %220 = vector.multi_reduction <add>, %219, %cst_86 [2] : vector<2x8x8xf32> to vector<2x8xf32>
    %221 = vector.shape_cast %220 : vector<2x8xf32> to vector<2x8x1xf32>
    %222 = tpu.reciprocal %221 {approx = true} : vector<2x8x1xf32> -> vector<2x8x1xf32>
    %223 = vector.broadcast %222 : vector<2x8x1xf32> to vector<2x8x8xf32>
    %224 = arith.mulf %219, %223 : vector<2x8x8xf32>
    "tpu.trace_start"() <{level = 10 : i32, message = "bqk,bkd->bqd"}> : () -> ()
    %cst_87 = arith.constant dense<0.000000e+00> : vector<2x8x8xf32>
    %225 = tpu.matmul %224, %211, %cst_87 {dimension_numbers = #tpu.dot_dimension_numbers<[2], [1], [1], [2], [0, 0, 0, 1, 1, 2], [0], [0]>} : vector<2x8x8xf32>, vector<2x8x8xf32>, vector<2x8x8xf32> -> vector<2x8x8xf32>
    "tpu.trace_stop"() : () -> ()
    %226 = vector.shape_cast %225 : vector<2x8x8xf32> to vector<16x8xf32>
    %227 = vector.extract_strided_slice %172 {offsets = [0, 0, 24], sizes = [2, 8, 8], strides = [1, 1, 1]} : vector<2x8x96xf32> to vector<2x8x8xf32>
    %228 = vector.extract_strided_slice %172 {offsets = [0, 0, 56], sizes = [2, 8, 8], strides = [1, 1, 1]} : vector<2x8x96xf32> to vector<2x8x8xf32>
    %229 = vector.extract_strided_slice %172 {offsets = [0, 0, 88], sizes = [2, 8, 8], strides = [1, 1, 1]} : vector<2x8x96xf32> to vector<2x8x8xf32>
    "tpu.trace_start"() <{level = 10 : i32, message = "bqd,bkd->bqk"}> : () -> ()
    %cst_88 = arith.constant dense<0.000000e+00> : vector<2x8x8xf32>
    %230 = tpu.matmul %227, %228, %cst_88 {dimension_numbers = #tpu.dot_dimension_numbers<[2], [2], [1], [1], [0, 0, 0, 1, 1, 1], [0], [0]>} : vector<2x8x8xf32>, vector<2x8x8xf32>, vector<2x8x8xf32> -> vector<2x8x8xf32>
    "tpu.trace_stop"() : () -> ()
    %cst_89 = arith.constant 0.353553385 : f32
    %231 = vector.broadcast %cst_89 : f32 to vector<2x8x8xf32>
    %232 = arith.mulf %230, %231 : vector<2x8x8xf32>
    %cst_90 = arith.constant dense<0xFF800000> : vector<2x8xf32>
    %233 = vector.multi_reduction <maximumf>, %232, %cst_90 [2] : vector<2x8x8xf32> to vector<2x8xf32>
    %234 = vector.shape_cast %233 : vector<2x8xf32> to vector<2x8x1xf32>
    %235 = vector.broadcast %234 : vector<2x8x1xf32> to vector<2x8x8xf32>
    %236 = arith.subf %232, %235 : vector<2x8x8xf32>
    %237 = math.exp %236 : vector<2x8x8xf32>
    %cst_91 = arith.constant dense<0.000000e+00> : vector<2x8xf32>
    %238 = vector.multi_reduction <add>, %237, %cst_91 [2] : vector<2x8x8xf32> to vector<2x8xf32>
    %239 = vector.shape_cast %238 : vector<2x8xf32> to vector<2x8x1xf32>
    %240 = tpu.reciprocal %239 {approx = true} : vector<2x8x1xf32> -> vector<2x8x1xf32>
    %241 = vector.broadcast %240 : vector<2x8x1xf32> to vector<2x8x8xf32>
    %242 = arith.mulf %237, %241 : vector<2x8x8xf32>
    "tpu.trace_start"() <{level = 10 : i32, message = "bqk,bkd->bqd"}> : () -> ()
    %cst_92 = arith.constant dense<0.000000e+00> : vector<2x8x8xf32>
    %243 = tpu.matmul %242, %229, %cst_92 {dimension_numbers = #tpu.dot_dimension_numbers<[2], [1], [1], [2], [0, 0, 0, 1, 1, 2], [0], [0]>} : vector<2x8x8xf32>, vector<2x8x8xf32>, vector<2x8x8xf32> -> vector<2x8x8xf32>
    "tpu.trace_stop"() : () -> ()
    %244 = vector.shape_cast %243 : vector<2x8x8xf32> to vector<16x8xf32>
    %245 = tpu.concatenate %190, %208, %226, %244 in 1 : vector<16x8xf32>, vector<16x8xf32>, vector<16x8xf32>, vector<16x8xf32> -> vector<16x32xf32>
    %c1_93 = arith.constant 1 : index
    %c0_94 = arith.constant 0 : index
    %c0_95 = arith.constant 0 : index
    %246 = vector.load %arg6[%c1_93, %c0_94, %c0_95] : memref<2x32x32xf32, #tpu.memory_space<vmem>>, vector<1x32x32xf32>
    %247 = vector.shape_cast %246 : vector<1x32x32xf32> to vector<32x32xf32>
    %cst_96 = arith.constant dense<0.000000e+00> : vector<16x32xf32>
    %248 = tpu.matmul %245, %247, %cst_96 {dimension_numbers = #tpu.dot_dimension_numbers<[1], [0], [0], [1], [0, 0, 1, 1], [], []>} : vector<16x32xf32>, vector<32x32xf32>, vector<16x32xf32> -> vector<16x32xf32>
    %249 = vector.extract_strided_slice %164 {offsets = [0, 0], sizes = [1, 32], strides = [1, 1]} : vector<6x32xf32> to vector<1x32xf32>
    %250 = vector.broadcast %249 : vector<1x32xf32> to vector<16x32xf32>
    %251 = arith.addf %248, %250 : vector<16x32xf32>
    %252 = arith.addf %162, %251 : vector<16x32xf32>
    %253 = vector.extract_strided_slice %164 {offsets = [1, 0], sizes = [1, 32], strides = [1, 1]} : vector<6x32xf32> to vector<1x32xf32>
    %254 = vector.extract_strided_slice %164 {offsets = [2, 0], sizes = [1, 32], strides = [1, 1]} : vector<6x32xf32> to vector<1x32xf32>
    %cst_97 = arith.constant dense<0.000000e+00> : vector<16xf32>
    %255 = vector.multi_reduction <add>, %252, %cst_97 [1] : vector<16x32xf32> to vector<16xf32>
    %256 = vector.shape_cast %255 : vector<16xf32> to vector<16x1xf32>
    %cst_98 = arith.constant 3.200000e+01 : f32
    %257 = vector.broadcast %cst_98 : f32 to vector<16x1xf32>
    %258 = arith.divf %256, %257 : vector<16x1xf32>
    %259 = vector.broadcast %258 : vector<16x1xf32> to vector<16x32xf32>
    %260 = arith.subf %252, %259 : vector<16x32xf32>
    %261 = arith.mulf %260, %260 : vector<16x32xf32>
    %cst_99 = arith.constant dense<0.000000e+00> : vector<16xf32>
    %262 = vector.multi_reduction <add>, %261, %cst_99 [1] : vector<16x32xf32> to vector<16xf32>
    %263 = vector.shape_cast %262 : vector<16xf32> to vector<16x1xf32>
    %cst_100 = arith.constant 3.200000e+01 : f32
    %264 = vector.broadcast %cst_100 : f32 to vector<16x1xf32>
    %265 = arith.divf %263, %264 : vector<16x1xf32>
    %cst_101 = arith.constant 9.99999974E-6 : f32
    %266 = vector.broadcast %cst_101 : f32 to vector<16x1xf32>
    %267 = arith.addf %265, %266 : vector<16x1xf32>
    %268 = math.rsqrt %267 : vector<16x1xf32>
    %269 = vector.broadcast %268 : vector<16x1xf32> to vector<16x32xf32>
    %270 = arith.mulf %260, %269 : vector<16x32xf32>
    %271 = vector.broadcast %253 : vector<1x32xf32> to vector<16x32xf32>
    %272 = arith.mulf %270, %271 : vector<16x32xf32>
    %273 = vector.broadcast %254 : vector<1x32xf32> to vector<16x32xf32>
    %274 = arith.addf %272, %273 : vector<16x32xf32>
    %c1_102 = arith.constant 1 : index
    %c0_103 = arith.constant 0 : index
    %c0_104 = arith.constant 0 : index
    %275 = vector.load %arg8[%c1_102, %c0_103, %c0_104] : memref<2x32x64xf32, #tpu.memory_space<vmem>>, vector<1x32x64xf32>
    %276 = vector.shape_cast %275 : vector<1x32x64xf32> to vector<32x64xf32>
    %cst_105 = arith.constant dense<0.000000e+00> : vector<16x64xf32>
    %277 = tpu.matmul %274, %276, %cst_105 {dimension_numbers = #tpu.dot_dimension_numbers<[1], [0], [0], [1], [0, 0, 1, 1], [], []>} : vector<16x32xf32>, vector<32x64xf32>, vector<16x64xf32> -> vector<16x64xf32>
    %c1_106 = arith.constant 1 : index
    %c0_107 = arith.constant 0 : index
    %c0_108 = arith.constant 0 : index
    %278 = vector.load %arg9[%c1_106, %c0_107, %c0_108] : memref<2x1x64xf32, #tpu.memory_space<vmem>>, vector<1x1x64xf32>
    %279 = vector.shape_cast %278 : vector<1x1x64xf32> to vector<1x64xf32>
    %280 = vector.broadcast %279 : vector<1x64xf32> to vector<16x64xf32>
    %281 = arith.addf %277, %280 : vector<16x64xf32>
    %cst_109 = arith.constant 0.000000e+00 : f32
    %282 = vector.broadcast %cst_109 : f32 to vector<16x64xf32>
    %283 = arith.maximumf %281, %282 : vector<16x64xf32>
    %c1_110 = arith.constant 1 : index
    %c0_111 = arith.constant 0 : index
    %c0_112 = arith.constant 0 : index
    %284 = vector.load %arg10[%c1_110, %c0_111, %c0_112] : memref<2x64x32xf32, #tpu.memory_space<vmem>>, vector<1x64x32xf32>
    %285 = vector.shape_cast %284 : vector<1x64x32xf32> to vector<64x32xf32>
    %cst_113 = arith.constant dense<0.000000e+00> : vector<16x32xf32>
    %286 = tpu.matmul %283, %285, %cst_113 {dimension_numbers = #tpu.dot_dimension_numbers<[1], [0], [0], [1], [0, 0, 1, 1], [], []>} : vector<16x64xf32>, vector<64x32xf32>, vector<16x32xf32> -> vector<16x32xf32>
    %287 = vector.extract_strided_slice %164 {offsets = [3, 0], sizes = [1, 32], strides = [1, 1]} : vector<6x32xf32> to vector<1x32xf32>
    %288 = vector.broadcast %287 : vector<1x32xf32> to vector<16x32xf32>
    %289 = arith.addf %286, %288 : vector<16x32xf32>
    %290 = arith.addf %274, %289 : vector<16x32xf32>
    %291 = vector.extract_strided_slice %164 {offsets = [4, 0], sizes = [1, 32], strides = [1, 1]} : vector<6x32xf32> to vector<1x32xf32>
    %292 = vector.extract_strided_slice %164 {offsets = [5, 0], sizes = [1, 32], strides = [1, 1]} : vector<6x32xf32> to vector<1x32xf32>
    %cst_114 = arith.constant dense<0.000000e+00> : vector<16xf32>
    %293 = vector.multi_reduction <add>, %290, %cst_114 [1] : vector<16x32xf32> to vector<16xf32>
    %294 = vector.shape_cast %293 : vector<16xf32> to vector<16x1xf32>
    %cst_115 = arith.constant 3.200000e+01 : f32
    %295 = vector.broadcast %cst_115 : f32 to vector<16x1xf32>
    %296 = arith.divf %294, %295 : vector<16x1xf32>
    %297 = vector.broadcast %296 : vector<16x1xf32> to vector<16x32xf32>
    %298 = arith.subf %290, %297 : vector<16x32xf32>
    %299 = arith.mulf %298, %298 : vector<16x32xf32>
    %cst_116 = arith.constant dense<0.000000e+00> : vector<16xf32>
    %300 = vector.multi_reduction <add>, %299, %cst_116 [1] : vector<16x32xf32> to vector<16xf32>
    %301 = vector.shape_cast %300 : vector<16xf32> to vector<16x1xf32>
    %cst_117 = arith.constant 3.200000e+01 : f32
    %302 = vector.broadcast %cst_117 : f32 to vector<16x1xf32>
    %303 = arith.divf %301, %302 : vector<16x1xf32>
    %cst_118 = arith.constant 9.99999974E-6 : f32
    %304 = vector.broadcast %cst_118 : f32 to vector<16x1xf32>
    %305 = arith.addf %303, %304 : vector<16x1xf32>
    %306 = math.rsqrt %305 : vector<16x1xf32>
    %307 = vector.broadcast %306 : vector<16x1xf32> to vector<16x32xf32>
    %308 = arith.mulf %298, %307 : vector<16x32xf32>
    %309 = vector.broadcast %291 : vector<1x32xf32> to vector<16x32xf32>
    %310 = arith.mulf %308, %309 : vector<16x32xf32>
    %311 = vector.broadcast %292 : vector<1x32xf32> to vector<16x32xf32>
    %312 = arith.addf %310, %311 : vector<16x32xf32>
    %313 = vector.extract_strided_slice %312 {offsets = [7, 0], sizes = [1, 32], strides = [1, 1]} : vector<16x32xf32> to vector<1x32xf32>
    %314 = vector.extract_strided_slice %312 {offsets = [15, 0], sizes = [1, 32], strides = [1, 1]} : vector<16x32xf32> to vector<1x32xf32>
    %315 = tpu.concatenate %313, %314 in 0 : vector<1x32xf32>, vector<1x32xf32> -> vector<2x32xf32>
    %c0_119 = arith.constant 0 : index
    %c0_120 = arith.constant 0 : index
    %316 = vector.load %arg11[%c0_119, %c0_120] : memref<32x128xf32, #tpu.memory_space<vmem>>, vector<32x128xf32>
    %cst_121 = arith.constant dense<0.000000e+00> : vector<2x128xf32>
    %317 = tpu.matmul %315, %316, %cst_121 {dimension_numbers = #tpu.dot_dimension_numbers<[1], [0], [0], [1], [0, 0, 1, 1], [], []>} : vector<2x32xf32>, vector<32x128xf32>, vector<2x128xf32> -> vector<2x128xf32>
    %c0_122 = arith.constant 0 : index
    %c0_123 = arith.constant 0 : index
    %318 = vector.load %arg12[%c0_122, %c0_123] : memref<1x128xf32, #tpu.memory_space<vmem>>, vector<1x128xf32>
    %319 = vector.broadcast %318 : vector<1x128xf32> to vector<2x128xf32>
    %320 = arith.addf %317, %319 : vector<2x128xf32>
    %cst_124 = arith.constant dense<0xFF800000> : vector<2xf32>
    %321 = vector.multi_reduction <maximumf>, %320, %cst_124 [1] : vector<2x128xf32> to vector<2xf32>
    %322 = vector.shape_cast %321 : vector<2xf32> to vector<2x1xf32>
    %323 = vector.broadcast %322 : vector<2x1xf32> to vector<2x128xf32>
    %324 = arith.subf %320, %323 : vector<2x128xf32>
    %325 = math.exp %324 : vector<2x128xf32>
    %cst_125 = arith.constant dense<0.000000e+00> : vector<2xf32>
    %326 = vector.multi_reduction <add>, %325, %cst_125 [1] : vector<2x128xf32> to vector<2xf32>
    %327 = vector.shape_cast %326 : vector<2xf32> to vector<2x1xf32>
    %328 = tpu.reciprocal %327 : vector<2x1xf32> -> vector<2x1xf32>
    %329 = vector.broadcast %328 : vector<2x1xf32> to vector<2x128xf32>
    %330 = arith.mulf %325, %329 : vector<2x128xf32>
    %c0_126 = arith.constant 0 : index
    %c0_127 = arith.constant 0 : index
    %331 = vector.load %arg13[%c0_126, %c0_127] : memref<2x128xf32, #tpu.memory_space<vmem>>, vector<2x128xf32>
    tpu.vector_store %arg13[%c0_126, %c0_127], %330 {strides = array<i32>} : memref<2x128xf32, #tpu.memory_space<vmem>>, vector<2x128xf32>,
    return
  }
}

</mosaic_0001>

<bundles_post_ra>
// kernel: tpu_custom_call.1
= control target key start
LH: loop header
LB: loop body
LE: loop exit
PB: predicated region body
PF: predicated region fallthrough
CT: control target
= control target key end

     0   :  { %18 = vsyncpa [#allocation3], 0  ;;  %s5338_s0 = inlined_call_operand.vmem [shape: f32[2,8,4], index: 0, kind: input, shape index: {}]   ;;  %s5339_s1 = inlined_call_operand.vmem [shape: f32[8,32], index: 1, kind: input, shape index: {}]   ;;  %s5340_s2 = inlined_call_operand.vmem [shape: f32[4,32], index: 2, kind: input, shape index: {}]   ;;  %s5341_s3 = inlined_call_operand.vmem [shape: f32[1,32], index: 3, kind: input, shape index: {}]   ;;  %s5342_s4 = inlined_call_operand.vmem [shape: f32[2,32,96], index: 4, kind: input, shape index: {}]   ;;  %s5343_s5 = inlined_call_operand.vmem [shape: f32[2,1,96], index: 5, kind: input, shape index: {}]   ;;  %s5344_s6 = inlined_call_operand.vmem [shape: f32[2,32,32], index: 6, kind: input, shape index: {}]   ;;  %s5345_s7 = inlined_call_operand.vmem [shape: f32[2,6,32], index: 7, kind: input, shape index: {}]   ;;  %s5346_s8 = inlined_call_operand.vmem [shape: f32[2,32,64], index: 8, kind: input, shape index: {}]   ;;  %s5347_s9 = inlined_call_operand.vmem [shape: f32[2,1,64], index: 9, kind: input, shape index: {}]   ;;  %s5348_s10 = inlined_call_operand.vmem [shape: f32[2,64,32], index: 10, kind: input, shape index: {}]   ;;  %s5349_s11 = inlined_call_operand.hbm [shape: f32[32,128], index: 11, kind: input, shape index: {}]   ;;  %s5350_s12 = inlined_call_operand.vmem [shape: f32[1,128], index: 12, kind: input, shape index: {}]   ;;  %s5351_s13 = inlined_call_operand.hbm [shape: f32[2,128], index: 13, kind: output, shape index: {}]  }
   0x1   :  { %19 = vsyncpa [#allocation4], 0  ;;  %s4644_s25 = smov [#allocation2]   ;;  %s4596_s29 = scalar_lea.hbm %s5349_s11, 512 }
   0x2   :  { %s47_s26 = sshll.u32 %s4644_s25, 4  ;;  %p4597_p0 = scmp.ne.s32.totalorder %s5349_s11, %s4596_s29  ;;  %s48_s26 = int_to_ptr.vmem [resolvable:$true] %s47_s26 }
   0x3   :  { %p4600_p1 = scmp.lt.u32.totalorder %s4596_s29, %s5349_s11 }
   0x5   :  { %p4602_p2 = pnand %p4600_p1, %p4597_p0 }
   0x7   :  { %4605 = shalt.err (!%p4602_p2)
}
   0x8   :  { %s4606_s17 = scalar_lea.vmem %s48_s26, 512  ;;  %p4611_p4 = scmp.lt.s32.totalorder %s48_s26, %s48_s26 }
   0x9   :  { %p4607_p3 = scmp.ne.s32.totalorder %s48_s26, %s4606_s17  ;;  %p4612_p5 = scmp.lt.s32.totalorder %s4606_s17, %s4606_s17 }
   0xb   :  { %p4613_p6 = por %p4612_p5, %p4611_p4 }
   0xd   :  { %p4614_p7 = pnand %p4613_p6, %p4607_p3 }
   0xf   :  { %4617 = shalt.err (!%p4614_p7)
}
  0x10   :  { %s4645_s18 = smov 128   ;;  %s4646_s19 = smov 8  }
  0x11   :  { %53 = dma.hbm_to_vmem [thread:$0]  %s5349_s11, 512, %s48_s26, [#allocation3], %s4645_s18, %s4645_s18, %s4646_s19  }
  0x12   :  { %4640 = dma.done.wait [#allocation3], 512  }
  0x13   :  { %4641 = vsyncadd [#allocation3], 4294966784  ;;  %vm76_vm0 = vcmask 1043456   ;;  %vm69_vm1 = vcmask 31744   ;;  %v61_v0 = vld [vmem:[%s5340_s2] sm:$0xf] }
  0x14   :  { %v59_v1 = vld [vmem:[%s5338_s0] sm:$0xff]  ;;  %v60_v2 = vld [vmem:[%s5338_s0 + $0x8] sm:$0xff]  ;;  %4126 = vmatprep.subr.msk.mxu0 %vm76_vm0, %v61_v0  ;;  %v161_v6 = vld [vmem:[%s5342_s4 + $0x10] sm:$0xff]  ;;  %vm170_vm2 = vcmask 261120   ;;  %v4647_v17 = vmov 0.0   ;;  %vm4648_vm3 = vmmov 0  }
  0x15   :  { %4128 = vmatprep.mubr.msk.f32.mxu0 %vm69_vm1, %v59_v1  ;;  %v159_v3 = vld [vmem:[%s5342_s4] sm:$0xff]  ;;  %v160_v4 = vld [vmem:[%s5342_s4 + $0x8] sm:$0xff]  ;;  %4127 = vmatpush3.msk.msra.mxu0 %vm76_vm0, %v61_v0  ;;  %v162_v7 = vld [vmem:[%s5342_s4 + $0x18] sm:$0xff]  ;;  %s4649_s21 = smov 96   ;;  %vm255_vm4 = vcmask 64512   ;;  %s4650_s22 = smov 64  }
  0x16   :  { %v4406_v5 = vpack.c.bf16 %v160_v4, %v159_v3  ;;  %4129 = vmatmul.mubr.msk.f32.vlgmr.msra.gmra.mrb[0].mxu0 %vm69_vm1, %v60_v2  ;;  %v4410_v8 = vpack.c.bf16 %v162_v7, %v161_v6  ;;  %v3901_v9 = vld [vmem:[%s5341_s3] ss:$0 sm:$0xff]  ;;  %4142 = vmatprep.subr.mxu0 %v4647_v17  ;;  %s4651_s23 = smov 88   ;;  %s4652_s24 = smov 120   ;;  %vm1608_vm5 = vcmask 195584   ;;  %vm1605_vm6 = vcmask 130048  }
  0x17   :  { %v155_v12 = vld [vmem:[%s5339_s1] sm:$0xff]  ;;  %4144 = vmatprep.mubr.msk.f32.mxu0 %vm4648_vm3, %v4647_v17  ;;  %s4653_s25 = smov 56   ;;  %s4654_s27 = smov 112   ;;  %vm1847_vm7 = vcmask 523264   ;;  %vm3787_vm8 = vcmask 1040384   ;;  %vm3873_vm9 = vcmask 1041408  }
  0x18   :  { %4407 = vmatprep.subr.bf16.mxu1 %v4406_v5  ;;  %v3905_v18 = vld [vmem:[%s5343_s5] ss:$0 sm:$0xff]  ;;  %s4655_s28 = smov 80   ;;  %s4656_s29 = smov 48  }
  0x19   :  { %4409 = vmatpush3.bf16.msra.mxu1 %v4406_v5  ;;  %s4657_s11 = smov 72   ;;  %s4658_s26 = smov 104  }
  0x1a   :  { %4411 = vmatprep.subr.bf16.mxu1 %v4410_v8  ;;  %s4659_s30 = smov 40   ;;  %s5354_s2 = smov 16  }
  0x1b   :  { %s5352_s3 = smov 24  }
  0x1d   :  { %4413 = vmatpush3.bf16.msra.mxu1 %v4410_v8 }
  0x1e   :  { %4162 = vmatprep.subr.mxu1 %v4647_v17 }
  0xe9   :  { %v4130_v10 = vpop.f32.mrb[0].mxu0 }
  0xea   :  { %v152_v11 = vadd.f32 %v4130_v10, %v3901_v9  ;;  %v146_v13 = vpop.f32.mrb[1].mxu0 }
  0xeb   :  { %v147_v14 = vadd.f32 %v3901_v9, %v146_v13 }
  0xec   :  { %v4776_v16 = vadd.f32 %v155_v12, %v152_v11 }
  0xed   :  { %v4774_v15 = vadd.f32 %v155_v12, %v147_v14 }
  0xef   :  { %4139 = vmatprep.mubr.msk.f32.mxu1 %vm170_vm2, %v4774_v15 }
  0xf0   :  { %4140 = vmatmul.mubr.msk.f32.vlgmr.msra.gmra.mrb[0].mxu1 %vm170_vm2, %v4776_v16 }
  0xf1   :  { %4164 = vmatprep.mubr.msk.f32.mxu1 %vm4648_vm3, %v4647_v17 }
 0x1c3   :  { %v4141_v19 = vpop.f32.mrb[0].mxu1 }
 0x1c4   :  { %v243_v20 = vpop.f32.mrb[1].mxu1  ;;  %v4795_v22 = vadd.f32 %v4141_v19, %v3905_v18 }
 0x1c5   :  { %v4791_v21 = vadd.f32 %v3905_v18, %v243_v20 }
 0x1c7   :  { %253 = vrot.lane.b32.xlu0 %v4791_v21, %s4649_s21 }
 0x1cb   :  { %331 = vrot.lane.b32.xlu0 %v4795_v22, %s4649_s21 }
 0x239   :  { %v254_v23 = vpop.permute.xlu0 %253 }
 0x23a   :  { %4143 = vmatpush3.xpose.msk.msra.mxu0 %vm255_vm4, %v254_v23 }
 0x23b   :  { %4147 = vmatprep.subr.mxu0 %v4647_v17 }
 0x23d   :  { %4145 = vmatmul.mubr.msk.f32.vlgmr.msra.gmra.mrb[2].mxu0 %vm255_vm4, %v4791_v21  ;;  %v332_v24 = vpop.permute.xlu0 %331 }
 0x23e   :  { %4148 = vmatpush3.xpose.msk.msra.mxu0 %vm255_vm4, %v332_v24  ;;  %4149 = vmatprep.mubr.msk.f32.mxu0 %vm4648_vm3, %v4647_v17 }
 0x23f   :  { %4152 = vmatprep.subr.mxu0 %v4647_v17 }
 0x241   :  { %4150 = vmatmul.mubr.msk.f32.vlgmr.msra.gmra.mrb[4].mxu0 %vm255_vm4, %v4795_v22 }
 0x242   :  { %4154 = vmatprep.mubr.msk.f32.mxu0 %vm4648_vm3, %v4647_v17 }
 0x310   :  { %v326_v25 = vpop.f32.mrb[2].mxu0 }
 0x311   :  { %v407_v26 = vmul.f32 0.35355338, %v326_v25  ;;  %v4146_v27 = vpop.f32.mrb[3].mxu0 }
 0x313   :  { %v409_v28 = vsel %vm255_vm4, %v407_v26, -inf }
 0x314   :  { %410 = vmax.xlane.f32.xlu1 %v409_v28  ;;  %v403_v29 = vpop.f32.mrb[4].mxu0 }
 0x315   :  { %v408_v30 = vmul.f32 0.35355338, %v403_v29  ;;  %v4151_v31 = vpop.f32.mrb[5].mxu0 }
 0x317   :  { %v412_v32 = vsel %vm255_vm4, %v408_v30, -inf }
 0x318   :  { %413 = vmax.xlane.f32.xlu1 %v412_v32 }
 0x329   :  { %431 = vrot.lane.b32.xlu1 %v4791_v21, %s4650_s22 }
 0x32d   :  { %507 = vrot.lane.b32.xlu1 %v4795_v22, %s4650_s22 }
 0x331   :  { %585 = vrot.lane.b32.xlu1 %v4791_v21, %s4651_s23 }
 0x335   :  { %663 = vrot.lane.b32.xlu1 %v4795_v22, %s4651_s23 }
 0x3a1   :  { %v411_v33 = vpop.xlane.xlu1 %410 }
 0x3a2   :  { %v415_v34 = vsub.f32 %v407_v26, %v411_v33 }
 0x3a4   :  { %v417_v35 = vmul.f32 1.442695, %v415_v34 }
 0x3a5   :  { %v414_v36 = vpop.xlane.xlu1 %413 }
 0x3a6   :  { %4512 = vpow2.f32 %v417_v35  ;;  %v416_v37 = vsub.f32 %v408_v30, %v414_v36 }
 0x3a8   :  { %v419_v38 = vmul.f32 1.442695, %v416_v37 }
 0x3a9   :  { %v432_v39 = vpop.permute.xlu1 %431 }
 0x3aa   :  { %4514 = vpow2.f32 %v419_v38  ;;  %4153 = vmatpush3.msra.mxu0 %v432_v39 }
 0x3ab   :  { %4157 = vmatprep.subr.mxu0 %v4647_v17 }
 0x3ad   :  { %v508_v40 = vpop.permute.xlu1 %507 }
 0x3b0   :  { %v4513_v41 = vpop.eup %4512 }
 0x3b1   :  { %v586_v42 = vpop.permute.xlu1 %585  ;;  %v421_v43 = vsel %vm255_vm4, %v4513_v41, 0.0 }
 0x3b2   :  { %422 = vadd.xlane.f32.xlu0 %v421_v43  ;;  %4163 = vmatpush3.xpose.msk.msra.mxu1 %vm255_vm4, %v586_v42 }
 0x3b3   :  { %4172 = vmatprep.subr.mxu1 %v4647_v17 }
 0x3b4   :  { %v4515_v44 = vpop.eup %4514 }
 0x3b5   :  { %v424_v45 = vsel %vm255_vm4, %v4515_v44, 0.0  ;;  %v664_v46 = vpop.permute.xlu1 %663 }
 0x3b6   :  { %425 = vadd.xlane.f32.xlu1 %v424_v45 }
 0x3c7   :  { %661 = vrot.lane.b32.xlu1 %v4795_v22, %s4652_s24 }
 0x3c8   :  { %583 = vrot.lane.b32.xlu0 %v4791_v21, %s4652_s24 }
 0x43f   :  { %v423_v47 = vpop.xlane.xlu0 %422 }
 0x440   :  { %4516 = vrcp.f32 %v423_v47 }
 0x443   :  { %v426_v48 = vpop.xlane.xlu1 %425  ;;  %v584_v49 = vpop.permute.xlu0 %583 }
 0x444   :  { %4518 = vrcp.f32 %v426_v48  ;;  %4165 = vmatmul.mubr.msk.f32.vlgmr.msra.gmra.mrb[2].mxu1 %vm255_vm4, %v584_v49 }
 0x445   :  { %4174 = vmatprep.mubr.msk.f32.mxu1 %vm4648_vm3, %v4647_v17 }
 0x447   :  { %v662_v54 = vpop.permute.xlu1 %661 }
 0x44a   :  { %v4517_v50 = vpop.eup %4516 }
 0x44b   :  { %v429_v51 = vmul.f32 %v4517_v50, %v4513_v41 }
 0x44d   :  { %4155 = vmatmul.mubr.msk.f32.vlgmr.msra.gmra.mrb[6].mxu0 %vm255_vm4, %v429_v51 }
 0x44e   :  { %v4519_v52 = vpop.eup %4518  ;;  %4158 = vmatpush3.msra.mxu0 %v508_v40  ;;  %4159 = vmatprep.mubr.msk.f32.mxu0 %vm4648_vm3, %v4647_v17 }
 0x44f   :  { %v430_v53 = vmul.f32 %v4519_v52, %v4515_v44  ;;  %4167 = vmatprep.subr.mxu0 %v4647_v17 }
 0x451   :  { %4160 = vmatmul.mubr.msk.f32.vlgmr.msra.gmra.mrb[8].mxu0 %vm255_vm4, %v430_v53 }
 0x452   :  { %4169 = vmatprep.mubr.msk.f32.mxu0 %vm4648_vm3, %v4647_v17 }
 0x455   :  { %4168 = vmatpush3.xpose.msk.msra.mxu0 %vm255_vm4, %v664_v46 }
 0x456   :  { %4177 = vmatprep.subr.mxu0 %v4647_v17 }
 0x458   :  { %4170 = vmatmul.mubr.msk.f32.vlgmr.msra.gmra.mrb[10].mxu0 %vm255_vm4, %v662_v54 }
 0x459   :  { %4179 = vmatprep.mubr.msk.f32.mxu0 %vm4648_vm3, %v4647_v17 }
 0x517   :  { %v657_v55 = vpop.f32.mrb[2].mxu1 }
 0x518   :  { %v739_v56 = vmul.f32 0.35355338, %v657_v55  ;;  %v4166_v57 = vpop.f32.mrb[3].mxu1 }
 0x51a   :  { %v741_v58 = vsel %vm255_vm4, %v739_v56, -inf }
 0x51b   :  { %742 = vmax.xlane.f32.xlu1 %v741_v58 }
 0x520   :  { %v4846_v59 = vpop.f32.mrb[6].mxu0 }
 0x521   :  { %v4156_v60 = vpop.f32.mrb[7].mxu0 }
 0x524   :  { %v4848_v61 = vpop.f32.mrb[8].mxu0 }
 0x525   :  { %v4161_v62 = vpop.f32.mrb[9].mxu0 }
 0x52b   :  { %v735_v63 = vpop.f32.mrb[10].mxu0 }
 0x52c   :  { %v740_v0 = vmul.f32 0.35355338, %v735_v63  ;;  %v4171_v1 = vpop.f32.mrb[11].mxu0 }
 0x52e   :  { %v744_v2 = vsel %vm255_vm4, %v740_v0, -inf }
 0x52f   :  { %745 = vmax.xlane.f32.xlu0 %v744_v2 }
 0x545   :  { %839 = vrot.lane.b32.xlu0 %v4795_v22, %s4653_s25 }
 0x549   :  { %915 = vrot.lane.b32.xlu0 %v4791_v21, %s4654_s27 }
 0x5a8   :  { %v743_v3 = vpop.xlane.xlu1 %742 }
 0x5a9   :  { %v747_v4 = vsub.f32 %v739_v56, %v743_v3 }
 0x5ab   :  { %v749_v5 = vmul.f32 1.442695, %v747_v4 }
 0x5ad   :  { %4520 = vpow2.f32 %v749_v5 }
 0x5b7   :  { %v4521_v6 = vpop.eup %4520 }
 0x5b8   :  { %v753_v7 = vsel %vm255_vm4, %v4521_v6, 0.0 }
 0x5b9   :  { %754 = vadd.xlane.f32.xlu1 %v753_v7 }
 0x5bc   :  { %v746_v8 = vpop.xlane.xlu0 %745 }
 0x5bd   :  { %v748_v10 = vsub.f32 %v740_v0, %v746_v8 }
 0x5bf   :  { %v751_v11 = vmul.f32 1.442695, %v748_v10 }
 0x5c0   :  { %v840_v9 = vpop.permute.xlu0 %839 }
 0x5c1   :  { %4178 = vmatpush3.msra.mxu0 %v840_v9  ;;  %4522 = vpow2.f32 %v751_v11 }
 0x5c2   :  { %4187 = vmatprep.subr.mxu0 %v4647_v17 }
 0x5c4   :  { %v916_v24 = vpop.permute.xlu0 %915 }
 0x5ca   :  { %763 = vrot.lane.b32.xlu1 %v4791_v21, %s4653_s25 }
 0x5cb   :  { %v4523_v12 = vpop.eup %4522 }
 0x5cc   :  { %v756_v13 = vsel %vm255_vm4, %v4523_v12, 0.0 }
 0x5ce   :  { %917 = vrot.lane.b32.xlu1 %v4791_v21, %s4655_s28 }
 0x5d2   :  { %995 = vrot.lane.b32.xlu1 %v4795_v22, %s4655_s28 }
 0x5f6   :  { %757 = vadd.xlane.f32.xlu1 %v756_v13 }
 0x607   :  { %993 = vrot.lane.b32.xlu1 %v4795_v22, %s4654_s27 }
 0x646   :  { %v755_v14 = vpop.xlane.xlu1 %754 }
 0x647   :  { %4524 = vrcp.f32 %v755_v14 }
 0x64a   :  { %v764_v18 = vpop.permute.xlu1 %763 }
 0x64b   :  { %4173 = vmatpush3.msra.mxu1 %v764_v18 }
 0x64c   :  { %4182 = vmatprep.subr.mxu1 %v4647_v17 }
 0x64e   :  { %v918_v23 = vpop.permute.xlu1 %917 }
 0x651   :  { %v4525_v19 = vpop.eup %4524 }
 0x652   :  { %v761_v20 = vmul.f32 %v4525_v19, %v4521_v6  ;;  %v996_v25 = vpop.permute.xlu1 %995 }
 0x654   :  { %4175 = vmatmul.mubr.msk.f32.vlgmr.msra.gmra.mrb[4].mxu1 %vm255_vm4, %v761_v20 }
 0x655   :  { %4183 = vmatpush3.xpose.msk.msra.mxu1 %vm255_vm4, %v918_v23  ;;  %4184 = vmatprep.mubr.msk.f32.mxu1 %vm4648_vm3, %v4647_v17 }
 0x656   :  { %4192 = vmatprep.subr.mxu1 %v4647_v17 }
 0x658   :  { %4185 = vmatmul.mubr.msk.f32.vlgmr.msra.gmra.mrb[6].mxu1 %vm255_vm4, %v916_v24 }
 0x659   :  { %4194 = vmatprep.mubr.msk.f32.mxu1 %vm4648_vm3, %v4647_v17 }
 0x683   :  { %v758_v26 = vpop.xlane.xlu1 %757 }
 0x684   :  { %4526 = vrcp.f32 %v758_v26 }
 0x687   :  { %v994_v29 = vpop.permute.xlu1 %993 }
 0x68e   :  { %v4527_v27 = vpop.eup %4526 }
 0x68f   :  { %v762_v28 = vmul.f32 %v4527_v27, %v4523_v12 }
 0x691   :  { %4180 = vmatmul.mubr.msk.f32.vlgmr.msra.gmra.mrb[12].mxu0 %vm255_vm4, %v762_v28 }
 0x692   :  { %4188 = vmatpush3.xpose.msk.msra.mxu0 %vm255_vm4, %v996_v25  ;;  %4189 = vmatprep.mubr.msk.f32.mxu0 %vm4648_vm3, %v4647_v17 }
 0x693   :  { %4197 = vmatprep.subr.mxu0 %v4647_v17 }
 0x695   :  { %4190 = vmatmul.mubr.msk.f32.vlgmr.msra.gmra.mrb[14].mxu0 %vm255_vm4, %v994_v29 }
 0x696   :  { %4199 = vmatprep.mubr.msk.f32.mxu0 %vm4648_vm3, %v4647_v17 }
 0x727   :  { %v4883_v30 = vpop.f32.mrb[4].mxu1 }
 0x728   :  { %v4176_v31 = vpop.f32.mrb[5].mxu1 }
 0x72b   :  { %v989_v32 = vpop.f32.mrb[6].mxu1 }
 0x72c   :  { %v1071_v33 = vmul.f32 0.35355338, %v989_v32  ;;  %v4186_v34 = vpop.f32.mrb[7].mxu1 }
 0x72e   :  { %v1073_v35 = vsel %vm255_vm4, %v1071_v33, -inf }
 0x72f   :  { %1074 = vmax.xlane.f32.xlu0 %v1073_v35 }
 0x764   :  { %v4886_v36 = vpop.f32.mrb[12].mxu0 }
 0x765   :  { %v4181_v37 = vpop.f32.mrb[13].mxu0 }
 0x766   :  { %v1613_v37 = vld [vmem:[%s5344_s6 + $0x10] sm:$0xff] }
 0x768   :  { %v1067_v38 = vpop.f32.mrb[14].mxu0 }
 0x769   :  { %v1072_v39 = vmul.f32 0.35355338, %v1067_v38  ;;  %v4191_v40 = vpop.f32.mrb[15].mxu0 }
 0x76b   :  { %v1076_v41 = vsel %vm255_vm4, %v1072_v39, -inf }
 0x76c   :  { %1077 = vmax.xlane.f32.xlu1 %v1076_v41 }
 0x77d   :  { %1095 = vrot.lane.b32.xlu1 %v4791_v21, %s4656_s29 }
 0x781   :  { %1249 = vrot.lane.b32.xlu1 %v4791_v21, %s4657_s11 }
 0x785   :  { %1327 = vrot.lane.b32.xlu1 %v4795_v22, %s4657_s11 }
 0x789   :  { %1325 = vrot.lane.b32.xlu1 %v4795_v22, %s4658_s26 }
 0x7bc   :  { %v1075_v42 = vpop.xlane.xlu0 %1074 }
 0x7bd   :  { %v1079_v43 = vsub.f32 %v1071_v33, %v1075_v42 }
 0x7bf   :  { %v1081_v44 = vmul.f32 1.442695, %v1079_v43 }
 0x7c1   :  { %4528 = vpow2.f32 %v1081_v44 }
 0x7cb   :  { %v4529_v45 = vpop.eup %4528 }
 0x7cc   :  { %v1085_v46 = vsel %vm255_vm4, %v4529_v45, 0.0 }
 0x7cd   :  { %1086 = vadd.xlane.f32.xlu0 %v1085_v46 }
 0x7e3   :  { %1171 = vrot.lane.b32.xlu0 %v4795_v22, %s4656_s29 }
 0x7f9   :  { %v1078_v47 = vpop.xlane.xlu1 %1077 }
 0x7fa   :  { %v1080_v48 = vsub.f32 %v1072_v39, %v1078_v47  ;;  %v1614_v39 = vld [vmem:[%s5344_s6 + $0x18] sm:$0xff] }
 0x7fb   :  { %v4418_v40 = vpack.c.bf16 %v1614_v39, %v1613_v37 }
 0x7fc   :  { %v1083_v49 = vmul.f32 1.442695, %v1080_v48 }
 0x7fd   :  { %v1096_v50 = vpop.permute.xlu1 %1095 }
 0x7fe   :  { %4530 = vpow2.f32 %v1083_v49  ;;  %4193 = vmatpush3.msra.mxu1 %v1096_v50 }
 0x7ff   :  { %4202 = vmatprep.subr.mxu1 %v4647_v17 }
 0x801   :  { %v1250_v57 = vpop.permute.xlu1 %1249 }
 0x805   :  { %v1328_v63 = vpop.permute.xlu1 %1327 }
 0x808   :  { %v4531_v51 = vpop.eup %4530 }
 0x809   :  { %v1088_v52 = vsel %vm255_vm4, %v4531_v51, 0.0  ;;  %v1326_v1 = vpop.permute.xlu1 %1325 }
 0x80a   :  { %1089 = vadd.xlane.f32.xlu0 %v1088_v52 }
 0x820   :  { %1247 = vrot.lane.b32.xlu0 %v4791_v21, %s4658_s26 }
 0x85a   :  { %v1087_v53 = vpop.xlane.xlu0 %1086 }
 0x85b   :  { %4532 = vrcp.f32 %v1087_v53 }
 0x85e   :  { %v1172_v54 = vpop.permute.xlu0 %1171 }
 0x85f   :  { %4198 = vmatpush3.msra.mxu0 %v1172_v54 }
 0x860   :  { %4207 = vmatprep.subr.mxu0 %v4647_v17 }
 0x865   :  { %v4533_v55 = vpop.eup %4532 }
 0x866   :  { %v1093_v56 = vmul.f32 %v4533_v55, %v4529_v45 }
 0x868   :  { %4195 = vmatmul.mubr.msk.f32.vlgmr.msra.gmra.mrb[8].mxu1 %vm255_vm4, %v1093_v56 }
 0x869   :  { %4203 = vmatpush3.xpose.msk.msra.mxu1 %vm255_vm4, %v1250_v57  ;;  %4204 = vmatprep.mubr.msk.f32.mxu1 %vm4648_vm3, %v4647_v17 }
 0x86a   :  { %4212 = vmatprep.subr.mxu1 %v4647_v17 }
 0x897   :  { %v1090_v58 = vpop.xlane.xlu0 %1089 }
 0x898   :  { %4534 = vrcp.f32 %v1090_v58 }
 0x89b   :  { %v1248_v60 = vpop.permute.xlu0 %1247 }
 0x89c   :  { %4205 = vmatmul.mubr.msk.f32.vlgmr.msra.gmra.mrb[10].mxu1 %vm255_vm4, %v1248_v60  ;;  %v4967_v60 = vld [vmem:[%s5345_s7] sm:$0x3f] }
 0x89d   :  { %4214 = vmatprep.mubr.msk.f32.mxu1 %vm4648_vm3, %v4647_v17 }
 0x8a2   :  { %v4535_v62 = vpop.eup %4534 }
 0x8a3   :  { %v1094_v0 = vmul.f32 %v4535_v62, %v4531_v51 }
 0x8a5   :  { %4200 = vmatmul.mubr.msk.f32.vlgmr.msra.gmra.mrb[16].mxu0 %vm255_vm4, %v1094_v0 }
 0x8a6   :  { %4208 = vmatpush3.xpose.msk.msra.mxu0 %vm255_vm4, %v1328_v63  ;;  %4209 = vmatprep.mubr.msk.f32.mxu0 %vm4648_vm3, %v4647_v17 }
 0x8a7   :  { %4217 = vmatprep.subr.mxu0 %v4647_v17 }
 0x8a9   :  { %4210 = vmatmul.mubr.msk.f32.vlgmr.msra.gmra.mrb[18].mxu0 %vm255_vm4, %v1326_v1 }
 0x8aa   :  { %4219 = vmatprep.mubr.msk.f32.mxu0 %vm4648_vm3, %v4647_v17 }
 0x93b   :  { %v1167_v2 = vpop.f32.mrb[8].mxu1 }
 0x93c   :  { %v4196_v3 = vpop.f32.mrb[9].mxu1 }
 0x96f   :  { %v1321_v4 = vpop.f32.mrb[10].mxu1 }
 0x970   :  { %v1403_v5 = vmul.f32 0.35355338, %v1321_v4  ;;  %v4206_v6 = vpop.f32.mrb[11].mxu1 }
 0x972   :  { %v1405_v7 = vsel %vm255_vm4, %v1403_v5, -inf }
 0x973   :  { %1406 = vmax.xlane.f32.xlu0 %v1405_v7 }
 0x978   :  { %v1243_v8 = vpop.f32.mrb[16].mxu0 }
 0x979   :  { %v4201_v9 = vpop.f32.mrb[17].mxu0 }
 0x97c   :  { %v1399_v10 = vpop.f32.mrb[18].mxu0 }
 0x97d   :  { %v1404_v11 = vmul.f32 0.35355338, %v1399_v10  ;;  %v4211_v12 = vpop.f32.mrb[19].mxu0 }
 0x97f   :  { %v1408_v13 = vsel %vm255_vm4, %v1404_v11, -inf }
 0x980   :  { %1409 = vmax.xlane.f32.xlu1 %v1408_v13 }
 0x991   :  { %1427 = vrot.lane.b32.xlu1 %v4791_v21, %s4659_s30 }
 0x995   :  { %1581 = vrot.lane.b32.xlu1 %v4883_v30, %s4646_s19 }
 0x999   :  { %1583 = vrot.lane.b32.xlu1 %v4886_v36, %s4646_s19  ;;  %v1612_v36 = vld [vmem:[%s5344_s6 + $0x8] sm:$0xff] }
 0x99d   :  { %1591 = vrot.lane.b32.xlu1 %v1243_v8, %s5354_s2 }
 0xa00   :  { %v1407_v14 = vpop.xlane.xlu0 %1406 }
 0xa01   :  { %v1411_v18 = vsub.f32 %v1403_v5, %v1407_v14 }
 0xa03   :  { %v1413_v19 = vmul.f32 1.442695, %v1411_v18  ;;  %v1742_v18 = vld [vmem:[%s5346_s8 + $0x8] sm:$0xff] }
 0xa05   :  { %4536 = vpow2.f32 %v1413_v19 }
 0xa0d   :  { %v1410_v20 = vpop.xlane.xlu1 %1409 }
 0xa0e   :  { %v1412_v23 = vsub.f32 %v1404_v11, %v1410_v20  ;;  %v1743_v20 = vld [vmem:[%s5346_s8 + $0x10] sm:$0xff] }
 0xa0f   :  { %v4537_v24 = vpop.eup %4536 }
 0xa10   :  { %v1415_v25 = vmul.f32 1.442695, %v1412_v23  ;;  %v1417_v26 = vsel %vm255_vm4, %v4537_v24, 0.0  ;;  %v1744_v23 = vld [vmem:[%s5346_s8 + $0x18] sm:$0xff] }
 0xa11   :  { %v1428_v21 = vpop.permute.xlu1 %1427  ;;  %1418 = vadd.xlane.f32.xlu0 %v1417_v26  ;;  %v1836_v26 = vld [vmem:[%s5348_s10 + $0x8] sm:$0xff] }
 0xa12   :  { %4538 = vpow2.f32 %v1415_v25  ;;  %4213 = vmatpush3.msra.mxu1 %v1428_v21  ;;  %v1835_v25 = vld [vmem:[%s5348_s10] sm:$0xff]  ;;  %v1837_v21 = vld [vmem:[%s5348_s10 + $0x10] sm:$0xff] }
 0xa15   :  { %v1582_v45 = vpop.permute.xlu1 %1581 }
 0xa16   :  { %v1603_v47 = vsel %vm255_vm4, %v4846_v59, %v1582_v45  ;;  %v1615_v59 = vlaneseq }
 0xa18   :  { %v4961_v57 = vshrl.u32 %v1615_v59, 7 }
 0xa19   :  { %v1584_v51 = vpop.permute.xlu1 %1583 }
 0xa1a   :  { %v1604_v53 = vsel %vm255_vm4, %v4848_v61, %v1584_v51  ;;  %v1617_v58 = vsub.s32 0, %v4961_v57  ;;  %v1737_v39 = vsub.s32 2, %v4961_v57  ;;  %v1842_v51 = vld [vmem:[%s5348_s10 + $0x38] sm:$0xff] }
 0xa1c   :  { %v4539_v27 = vpop.eup %4538  ;;  %v1618_v61 = vrot.slane %v4967_v60, %v1617_v58 }
 0xa1d   :  { %v1420_v28 = vsel %vm255_vm4, %v4539_v27, 0.0  ;;  %v1592_v52 = vpop.permute.xlu1 %1591 }
 0xa1e   :  { %1421 = vadd.xlane.f32.xlu0 %v1420_v28  ;;  %v1607_v54 = vsel %vm1605_vm6, %v1604_v53, %v1592_v52  ;;  %v1838_v28 = vld [vmem:[%s5348_s10 + $0x18] sm:$0xff]  ;;  %v3934_v53 = vld [vmem:[%s5347_s9] ss:$0 sm:$0xff] }
 0xa34   :  { %1503 = vrot.lane.b32.xlu0 %v4795_v22, %s4659_s30  ;;  %v1611_v22 = vld [vmem:[%s5344_s6] sm:$0xff] }
 0xa35   :  { %v4414_v38 = vpack.c.bf16 %v1612_v36, %v1611_v22 }
 0xa37   :  { %4415 = vmatprep.subr.bf16.mxu1 %v4414_v38 }
 0xa38   :  { %1589 = vrot.lane.b32.xlu0 %v1167_v2, %s5354_s2 }
 0xa9e   :  { %v1419_v29 = vpop.xlane.xlu0 %1418 }
 0xa9f   :  { %4540 = vrcp.f32 %v1419_v29  ;;  %v4434_v29 = vpack.c.bf16 %v1838_v28, %v1837_v21 }
 0xaa9   :  { %v4541_v30 = vpop.eup %4540 }
 0xaaa   :  { %v1425_v31 = vmul.f32 %v4541_v30, %v4537_v24  ;;  %v4426_v24 = vpack.c.bf16 %v1744_v23, %v1743_v20  ;;  %v1839_v30 = vld [vmem:[%s5348_s10 + $0x20] sm:$0xff]  ;;  %v3941_v23 = vld [vmem:[%s5342_s4 + $0x28] sm:$0xff] }
 0xaab   :  { %v1422_v32 = vpop.xlane.xlu0 %1421  ;;  %v3940_v20 = vld [vmem:[%s5342_s4 + $0x20] sm:$0xff] }
 0xaac   :  { %4542 = vrcp.f32 %v1422_v32  ;;  %4215 = vmatmul.mubr.msk.f32.vlgmr.msra.gmra.mrb[12].mxu1 %vm255_vm4, %v1425_v31  ;;  %v1840_v31 = vld [vmem:[%s5348_s10 + $0x28] sm:$0xff] }
 0xaad   :  { %4417 = vmatpush3.bf16.msra.mxu1 %v4414_v38  ;;  %v4438_v32 = vpack.c.bf16 %v1840_v31, %v1839_v30  ;;  %v1731_v38 = vsub.s32 1, %v4961_v57 }
 0xaae   :  { %4419 = vmatprep.subr.bf16.mxu1 %v4418_v40 }
 0xaaf   :  { %v1504_v33 = vpop.permute.xlu0 %1503 }
 0xab0   :  { %4218 = vmatpush3.msra.mxu0 %v1504_v33 }
 0xab1   :  { %4421 = vmatpush3.bf16.msra.mxu1 %v4418_v40  ;;  %v1732_v40 = vrot.slane %v4967_v60, %v1731_v38 }
 0xab3   :  { %v1590_v46 = vpop.permute.xlu0 %1589 }
 0xab4   :  { %v1606_v48 = vsel %vm1605_vm6, %v1603_v47, %v1590_v46 }
 0xab6   :  { %v4543_v34 = vpop.eup %4542 }
 0xab7   :  { %v1426_v35 = vmul.f32 %v4543_v34, %v4539_v27  ;;  %v4430_v27 = vpack.c.bf16 %v1836_v26, %v1835_v25  ;;  %v3942_v25 = vld [vmem:[%s5342_s4 + $0x30] sm:$0xff]  ;;  %v3943_v26 = vld [vmem:[%s5342_s4 + $0x38] sm:$0xff] }
 0xab8   :  { %v4450_v21 = vpack.c.bf16 %v3943_v26, %v3942_v25 }
 0xab9   :  { %4220 = vmatmul.mubr.msk.f32.vlgmr.msra.gmra.mrb[20].mxu0 %vm255_vm4, %v1426_v35  ;;  %4431 = vmatprep.subr.bf16.mxu1 %v4430_v27 }
 0xb7f   :  { %v1499_v41 = vpop.f32.mrb[12].mxu1 }
 0xb80   :  { %1597 = vrot.lane.b32.xlu0 %v1499_v41, %s5352_s3  ;;  %v4216_v42 = vpop.f32.mrb[13].mxu1 }
 0xb8c   :  { %v1575_v43 = vpop.f32.mrb[20].mxu0 }
 0xb8d   :  { %1599 = vrot.lane.b32.xlu1 %v1575_v43, %s5352_s3  ;;  %v4221_v44 = vpop.f32.mrb[21].mxu0  ;;  %v1738_v43 = vrot.slane %v4967_v60, %v1737_v39 }
 0xbf2   :  { %v1598_v49 = vpop.permute.xlu0 %1597 }
 0xbf3   :  { %v1609_v50 = vsel %vm1608_vm5, %v1606_v48, %v1598_v49 }
 0xbf4   :  { %4230 = vmatprep.mubr.msk.f32.mxu1 %vm170_vm2, %v1609_v50  ;;  %v1841_v50 = vld [vmem:[%s5348_s10 + $0x30] sm:$0xff] }
 0xbf5   :  { %v4442_v52 = vpack.c.bf16 %v1842_v51, %v1841_v50 }
 0xbff   :  { %v1600_v55 = vpop.permute.xlu1 %1599 }
 0xc00   :  { %v1610_v56 = vsel %vm1608_vm5, %v1607_v54, %v1600_v55 }
 0xc01   :  { %4231 = vmatmul.mubr.msk.f32.vlgmr.msra.gmra.mrb[14].mxu1 %vm170_vm2, %v1610_v56 }
 0xc02   :  { %4433 = vmatpush3.bf16.msra.mxu1 %v4430_v27 }
 0xc03   :  { %4435 = vmatprep.subr.bf16.mxu1 %v4434_v29 }
 0xc06   :  { %4437 = vmatpush3.bf16.msra.mxu1 %v4434_v29 }
 0xc07   :  { %4439 = vmatprep.subr.bf16.mxu1 %v4438_v32 }
 0xc0a   :  { %4441 = vmatpush3.bf16.msra.mxu1 %v4438_v32 }
 0xc0b   :  { %4443 = vmatprep.subr.bf16.mxu1 %v4442_v52 }
 0xc0e   :  { %4445 = vmatpush3.bf16.msra.mxu1 %v4442_v52 }
 0xc0f   :  { %4284 = vmatprep.subr.mxu1 %v4647_v17 }
 0xcd4   :  { %v4232_v62 = vpop.f32.mrb[14].mxu1 }
 0xcd5   :  { %v1697_v63 = vadd.f32 %v4232_v62, %v1618_v61  ;;  %v1691_v0 = vpop.f32.mrb[15].mxu1 }
 0xcd6   :  { %v1692_v1 = vadd.f32 %v1691_v0, %v1618_v61 }
 0xcd7   :  { %v1701_v2 = vadd.f32 %v1697_v63, %v4776_v16  ;;  %v1845_v63 = vsub.s32 3, %v4961_v57 }
 0xcd8   :  { %v1700_v3 = vadd.f32 %v1692_v1, %v4774_v15  ;;  %v1741_v15 = vld [vmem:[%s5346_s8] sm:$0xff] }
 0xcd9   :  { %v1705_v4 = vsel %vm170_vm2, %v1701_v2, 0.0  ;;  %v4422_v19 = vpack.c.bf16 %v1742_v18, %v1741_v15  ;;  %v1846_v0 = vrot.slane %v4967_v60, %v1845_v63 }
 0xcda   :  { %1706 = vadd.xlane.f32.xlu1 %v1705_v4  ;;  %v1702_v5 = vsel %vm170_vm2, %v1700_v3, 0.0 }
 0xcdb   :  { %1703 = vadd.xlane.f32.xlu0 %v1702_v5  ;;  %4423 = vmatprep.subr.bf16.mxu0 %v4422_v19 }
 0xcdc   :  { %4425 = vmatpush3.bf16.msra.mxu0 %v4422_v19 }
 0xcdd   :  { %4427 = vmatprep.subr.bf16.mxu0 %v4426_v24 }
 0xce0   :  { %4429 = vmatpush3.bf16.msra.mxu0 %v4426_v24  ;;  %v4446_v24 = vpack.c.bf16 %v3941_v23, %v3940_v20 }
 0xce2   :  { %4447 = vmatprep.subr.bf16.mxu0 %v4446_v24 }
 0xd67   :  { %v1707_v6 = vpop.xlane.xlu1 %1706 }
 0xd68   :  { %v1710_v7 = vmul.f32 0.03125, %v1707_v6  ;;  %v1704_v8 = vpop.xlane.xlu0 %1703 }
 0xd69   :  { %v1709_v9 = vmul.f32 0.03125, %v1704_v8 }
 0xd6a   :  { %v1712_v10 = vsub.f32 %v1701_v2, %v1710_v7 }
 0xd6b   :  { %v1711_v11 = vsub.f32 %v1700_v3, %v1709_v9 }
 0xd6c   :  { %v1714_v14 = vmul.f32 %v1712_v10, %v1712_v10 }
 0xd6d   :  { %v1713_v12 = vmul.f32 %v1711_v11, %v1711_v11 }
 0xd6e   :  { %v1718_v16 = vsel %vm170_vm2, %v1714_v14, 0.0 }
 0xd6f   :  { %v1715_v13 = vsel %vm170_vm2, %v1713_v12, 0.0 }
 0xd70   :  { %1716 = vadd.xlane.f32.xlu0 %v1715_v13 }
 0xd74   :  { %1719 = vadd.xlane.f32.xlu0 %v1718_v16 }
 0xdfd   :  { %v1717_v33 = vpop.xlane.xlu0 %1716 }
 0xdfe   :  { %v1721_v34 = vmul.f32 0.03125, %v1717_v33  ;;  %v1959_v33 = vsub.s32 4, %v4961_v57 }
 0xe00   :  { %v1723_v35 = vadd.f32 1e-05, %v1721_v34  ;;  %v1965_v34 = vsub.s32 5, %v4961_v57 }
 0xe01   :  { %v1720_v22 = vpop.xlane.xlu0 %1719 }
 0xe02   :  { %4544 = vrsqrt.f32 %v1723_v35  ;;  %v1722_v36 = vmul.f32 0.03125, %v1720_v22  ;;  %v1960_v35 = vrot.slane %v4967_v60, %v1959_v33 }
 0xe04   :  { %v1724_v37 = vadd.f32 1e-05, %v1722_v36 }
 0xe06   :  { %4546 = vrsqrt.f32 %v1724_v37 }
 0xe0c   :  { %v4545_v41 = vpop.eup %4544 }
 0xe0d   :  { %v1727_v42 = vmul.f32 %v4545_v41, %v1711_v11  ;;  %v1966_v41 = vrot.slane %v4967_v60, %v1965_v34 }
 0xe0f   :  { %v1733_v44 = vmul.f32 %v1732_v40, %v1727_v42 }
 0xe10   :  { %v4547_v45 = vpop.eup %4546 }
 0xe11   :  { %v1728_v46 = vmul.f32 %v4547_v45, %v1712_v10  ;;  %v1739_v47 = vadd.f32 %v1738_v43, %v1733_v44 }
 0xe13   :  { %v1734_v48 = vmul.f32 %v1732_v40, %v1728_v46  ;;  %4241 = vmatprep.mubr.msk.f32.mxu0 %vm170_vm2, %v1739_v47  ;;  %v3945_v46 = vld [vmem:[%s5343_s5 + $0x1] ss:$0 sm:$0xff]  ;;  %s5356_s5 = smov 16  }
 0xe15   :  { %v1740_v49 = vadd.f32 %v1738_v43, %v1734_v48 }
 0xe17   :  { %4242 = vmatmul.mubr.msk.f32.vlgmr.msra.gmra.mrb[22].mxu0 %vm170_vm2, %v1740_v49 }
 0xe18   :  { %4449 = vmatpush3.bf16.msra.mxu0 %v4446_v24 }
 0xe19   :  { %4451 = vmatprep.subr.bf16.mxu0 %v4450_v21 }
 0xe1c   :  { %4453 = vmatpush3.bf16.msra.mxu0 %v4450_v21 }
 0xe1d   :  { %4274 = vmatprep.subr.mxu0 %v4647_v17 }
 0xeea   :  { %v4243_v54 = vpop.f32.mrb[22].mxu0 }
 0xeeb   :  { %v1830_v55 = vadd.f32 %v4243_v54, %v3934_v53  ;;  %v1824_v56 = vpop.f32.mrb[23].mxu0 }
 0xeec   :  { %v1825_v59 = vadd.f32 %v3934_v53, %v1824_v56 }
 0xeed   :  { %v1834_v62 = vmax.f32 %v1830_v55, 0.0 }
 0xeee   :  { %v1833_v61 = vmax.f32 %v1825_v59, 0.0 }
 0xef0   :  { %4260 = vmatprep.mubr.msk.f32.mxu1 %vm1847_vm7, %v1833_v61 }
 0xef1   :  { %4261 = vmatmul.mubr.msk.f32.vlgmr.msra.gmra.mrb[16].mxu1 %vm1847_vm7, %v1834_v62 }
 0xef2   :  { %4286 = vmatprep.mubr.msk.f32.mxu1 %vm4648_vm3, %v4647_v17 }
 0xfc4   :  { %v4262_v1 = vpop.f32.mrb[16].mxu1 }
 0xfc5   :  { %v1926_v2 = vadd.f32 %v4262_v1, %v1846_v0  ;;  %v1920_v3 = vpop.f32.mrb[17].mxu1 }
 0xfc6   :  { %v1921_v4 = vadd.f32 %v1920_v3, %v1846_v0 }
 0xfc7   :  { %v1930_v5 = vadd.f32 %v1926_v2, %v1740_v49 }
 0xfc8   :  { %v1929_v6 = vadd.f32 %v1921_v4, %v1739_v47 }
 0xfc9   :  { %v1934_v7 = vsel %vm170_vm2, %v1930_v5, 0.0 }
 0xfca   :  { %1935 = vadd.xlane.f32.xlu0 %v1934_v7  ;;  %v1931_v8 = vsel %vm170_vm2, %v1929_v6, 0.0 }
 0xfcb   :  { %1932 = vadd.xlane.f32.xlu1 %v1931_v8 }
0x1057   :  { %v1936_v9 = vpop.xlane.xlu0 %1935 }
0x1058   :  { %v1938_v10 = vmul.f32 0.03125, %v1936_v9  ;;  %v1933_v11 = vpop.xlane.xlu1 %1932 }
0x1059   :  { %v1937_v12 = vmul.f32 0.03125, %v1933_v11 }
0x105a   :  { %v1940_v13 = vsub.f32 %v1930_v5, %v1938_v10 }
0x105b   :  { %v1939_v14 = vsub.f32 %v1929_v6, %v1937_v12 }
0x105c   :  { %v1942_v16 = vmul.f32 %v1940_v13, %v1940_v13 }
0x105d   :  { %v1941_v15 = vmul.f32 %v1939_v14, %v1939_v14 }
0x105e   :  { %v1946_v18 = vsel %vm170_vm2, %v1942_v16, 0.0 }
0x105f   :  { %1947 = vadd.xlane.f32.xlu0 %v1946_v18  ;;  %v1943_v19 = vsel %vm170_vm2, %v1941_v15, 0.0 }
0x1060   :  { %1944 = vadd.xlane.f32.xlu1 %v1943_v19 }
0x10ec   :  { %v1948_v27 = vpop.xlane.xlu0 %1947 }
0x10ed   :  { %v1950_v28 = vmul.f32 0.03125, %v1948_v27  ;;  %v1945_v29 = vpop.xlane.xlu1 %1944 }
0x10ee   :  { %v1949_v30 = vmul.f32 0.03125, %v1945_v29 }
0x10ef   :  { %v1952_v31 = vadd.f32 1e-05, %v1950_v28 }
0x10f0   :  { %v1951_v32 = vadd.f32 1e-05, %v1949_v30 }
0x10f1   :  { %4548 = vrsqrt.f32 %v1952_v31 }
0x10f2   :  { %4550 = vrsqrt.f32 %v1951_v32 }
0x10fb   :  { %v4549_v22 = vpop.eup %4548 }
0x10fc   :  { %v4551_v36 = vpop.eup %4550  ;;  %v1956_v37 = vmul.f32 %v4549_v22, %v1940_v13 }
0x10fd   :  { %v1955_v40 = vmul.f32 %v4551_v36, %v1939_v14 }
0x10fe   :  { %v1962_v42 = vmul.f32 %v1960_v35, %v1956_v37 }
0x10ff   :  { %v1961_v43 = vmul.f32 %v1960_v35, %v1955_v40 }
0x1100   :  { %v5063_v45 = vadd.f32 %v1966_v41, %v1962_v42 }
0x1101   :  { %v5061_v44 = vadd.f32 %v1966_v41, %v1961_v43 }
0x1103   :  { %4271 = vmatprep.mubr.msk.f32.mxu0 %vm170_vm2, %v5061_v44 }
0x1104   :  { %4272 = vmatmul.mubr.msk.f32.vlgmr.msra.gmra.mrb[24].mxu0 %vm170_vm2, %v5063_v45 }
0x1105   :  { %4276 = vmatprep.mubr.msk.f32.mxu0 %vm4648_vm3, %v4647_v17 }
0x11d7   :  { %v4273_v60 = vpop.f32.mrb[24].mxu0 }
0x11d8   :  { %v5074_v47 = vadd.f32 %v4273_v60, %v3945_v46  ;;  %v2056_v48 = vpop.f32.mrb[25].mxu0 }
0x11d9   :  { %v5076_v49 = vadd.f32 %v3945_v46, %v2056_v48 }
0x11da   :  { %2143 = vrot.lane.b32.xlu0 %v5074_v47, %s4649_s21 }
0x11db   :  { %2066 = vrot.lane.b32.xlu1 %v5076_v49, %s4649_s21 }
0x124c   :  { %v2144_v51 = vpop.permute.xlu0 %2143 }
0x124d   :  { %v2067_v50 = vpop.permute.xlu1 %2066 }
0x124e   :  { %4275 = vmatpush3.xpose.msk.msra.mxu0 %vm255_vm4, %v2067_v50 }
0x124f   :  { %4279 = vmatprep.subr.mxu0 %v4647_v17 }
0x1251   :  { %4277 = vmatmul.mubr.msk.f32.vlgmr.msra.gmra.mrb[26].mxu0 %vm255_vm4, %v5076_v49 }
0x1252   :  { %4280 = vmatpush3.xpose.msk.msra.mxu0 %vm255_vm4, %v2144_v51  ;;  %4281 = vmatprep.mubr.msk.f32.mxu0 %vm4648_vm3, %v4647_v17 }
0x1253   :  { %4289 = vmatprep.subr.mxu0 %v4647_v17 }
0x1255   :  { %4282 = vmatmul.mubr.msk.f32.vlgmr.msra.gmra.mrb[28].mxu0 %vm255_vm4, %v5074_v47 }
0x1256   :  { %4291 = vmatprep.mubr.msk.f32.mxu0 %vm4648_vm3, %v4647_v17 }
0x1324   :  { %v2138_v52 = vpop.f32.mrb[26].mxu0 }
0x1325   :  { %v2219_v53 = vmul.f32 0.35355338, %v2138_v52  ;;  %v4278_v54 = vpop.f32.mrb[27].mxu0 }
0x1327   :  { %v2221_v55 = vsel %vm255_vm4, %v2219_v53, -inf }
0x1328   :  { %2222 = vmax.xlane.f32.xlu1 %v2221_v55  ;;  %v2215_v56 = vpop.f32.mrb[28].mxu0 }
0x1329   :  { %v2220_v59 = vmul.f32 0.35355338, %v2215_v56  ;;  %v4283_v61 = vpop.f32.mrb[29].mxu0 }
0x132b   :  { %v2224_v62 = vsel %vm255_vm4, %v2220_v59, -inf }
0x132c   :  { %2225 = vmax.xlane.f32.xlu0 %v2224_v62 }
0x1339   :  { %2243 = vrot.lane.b32.xlu1 %v5076_v49, %s4650_s22 }
0x133d   :  { %2397 = vrot.lane.b32.xlu1 %v5076_v49, %s4651_s23 }
0x1341   :  { %2475 = vrot.lane.b32.xlu1 %v5074_v47, %s4651_s23 }
0x1342   :  { %2319 = vrot.lane.b32.xlu0 %v5074_v47, %s4650_s22 }
0x13b5   :  { %v2223_v0 = vpop.xlane.xlu1 %2222 }
0x13b6   :  { %v2227_v1 = vsub.f32 %v2219_v53, %v2223_v0 }
0x13b8   :  { %v2229_v2 = vmul.f32 1.442695, %v2227_v1 }
0x13b9   :  { %v2244_v3 = vpop.permute.xlu1 %2243  ;;  %v2226_v4 = vpop.xlane.xlu0 %2225 }
0x13ba   :  { %4552 = vpow2.f32 %v2229_v2  ;;  %v2228_v5 = vsub.f32 %v2220_v59, %v2226_v4  ;;  %4285 = vmatpush3.msra.mxu1 %v2244_v3 }
0x13bb   :  { %4294 = vmatprep.subr.mxu1 %v4647_v17 }
0x13bc   :  { %v2231_v6 = vmul.f32 1.442695, %v2228_v5 }
0x13bd   :  { %v2320_v7 = vpop.permute.xlu0 %2319  ;;  %v2398_v12 = vpop.permute.xlu1 %2397 }
0x13be   :  { %4554 = vpow2.f32 %v2231_v6  ;;  %4290 = vmatpush3.msra.mxu0 %v2320_v7 }
0x13bf   :  { %4299 = vmatprep.subr.mxu0 %v4647_v17 }
0x13c1   :  { %v2476_v13 = vpop.permute.xlu1 %2475 }
0x13c4   :  { %v4553_v8 = vpop.eup %4552 }
0x13c5   :  { %v2233_v9 = vsel %vm255_vm4, %v4553_v8, 0.0 }
0x13c6   :  { %2234 = vadd.xlane.f32.xlu1 %v2233_v9 }
0x13c8   :  { %v4555_v10 = vpop.eup %4554 }
0x13c9   :  { %v2236_v11 = vsel %vm255_vm4, %v4555_v10, 0.0 }
0x13ca   :  { %2237 = vadd.xlane.f32.xlu0 %v2236_v11 }
0x13d7   :  { %2473 = vrot.lane.b32.xlu1 %v5074_v47, %s4652_s24 }
0x13e0   :  { %2395 = vrot.lane.b32.xlu0 %v5076_v49, %s4652_s24 }
0x1453   :  { %v2235_v14 = vpop.xlane.xlu1 %2234 }
0x1454   :  { %4556 = vrcp.f32 %v2235_v14 }
0x1457   :  { %v2238_v16 = vpop.xlane.xlu0 %2237  ;;  %v2474_v24 = vpop.permute.xlu1 %2473 }
0x1458   :  { %4558 = vrcp.f32 %v2238_v16 }
0x145b   :  { %v2396_v23 = vpop.permute.xlu0 %2395 }
0x145e   :  { %v4557_v15 = vpop.eup %4556 }
0x145f   :  { %v2241_v18 = vmul.f32 %v4557_v15, %v4553_v8 }
0x1461   :  { %4287 = vmatmul.mubr.msk.f32.vlgmr.msra.gmra.mrb[18].mxu1 %vm255_vm4, %v2241_v18 }
0x1462   :  { %v4559_v19 = vpop.eup %4558  ;;  %4295 = vmatpush3.xpose.msk.msra.mxu1 %vm255_vm4, %v2398_v12  ;;  %4296 = vmatprep.mubr.msk.f32.mxu1 %vm4648_vm3, %v4647_v17 }
0x1463   :  { %v2242_v20 = vmul.f32 %v4559_v19, %v4555_v10  ;;  %4304 = vmatprep.subr.mxu1 %v4647_v17 }
0x1465   :  { %4292 = vmatmul.mubr.msk.f32.vlgmr.msra.gmra.mrb[30].mxu0 %vm255_vm4, %v2242_v20  ;;  %4297 = vmatmul.mubr.msk.f32.vlgmr.msra.gmra.mrb[20].mxu1 %vm255_vm4, %v2396_v23 }
0x1466   :  { %4300 = vmatpush3.xpose.msk.msra.mxu0 %vm255_vm4, %v2476_v13  ;;  %4301 = vmatprep.mubr.msk.f32.mxu0 %vm4648_vm3, %v4647_v17 }
0x1467   :  { %4309 = vmatprep.subr.mxu0 %v4647_v17  ;;  %4306 = vmatprep.mubr.msk.f32.mxu1 %vm4648_vm3, %v4647_v17 }
0x1469   :  { %4302 = vmatmul.mubr.msk.f32.vlgmr.msra.gmra.mrb[32].mxu0 %vm255_vm4, %v2474_v24 }
0x146a   :  { %4311 = vmatprep.mubr.msk.f32.mxu0 %vm4648_vm3, %v4647_v17 }
0x1534   :  { %v5128_v25 = vpop.f32.mrb[18].mxu1 }
0x1535   :  { %v4288_v26 = vpop.f32.mrb[19].mxu1 }
0x1538   :  { %v5130_v21 = vpop.f32.mrb[30].mxu0  ;;  %v2469_v27 = vpop.f32.mrb[20].mxu1 }
0x1539   :  { %v2551_v28 = vmul.f32 0.35355338, %v2469_v27  ;;  %v4293_v29 = vpop.f32.mrb[31].mxu0  ;;  %v4298_v30 = vpop.f32.mrb[21].mxu1 }
0x153b   :  { %v2553_v31 = vsel %vm255_vm4, %v2551_v28, -inf }
0x153c   :  { %2554 = vmax.xlane.f32.xlu0 %v2553_v31  ;;  %v2547_v32 = vpop.f32.mrb[32].mxu0 }
0x153d   :  { %v2552_v35 = vmul.f32 0.35355338, %v2547_v32  ;;  %v4303_v22 = vpop.f32.mrb[33].mxu0 }
0x153f   :  { %v2556_v36 = vsel %vm255_vm4, %v2552_v35, -inf }
0x1540   :  { %2557 = vmax.xlane.f32.xlu1 %v2556_v36 }
0x1551   :  { %2575 = vrot.lane.b32.xlu1 %v5076_v49, %s4653_s25 }
0x1552   :  { %2651 = vrot.lane.b32.xlu0 %v5074_v47, %s4653_s25 }
0x1555   :  { %2729 = vrot.lane.b32.xlu1 %v5076_v49, %s4655_s28 }
0x1559   :  { %2807 = vrot.lane.b32.xlu1 %v5074_v47, %s4655_s28 }
0x155d   :  { %2805 = vrot.lane.b32.xlu1 %v5074_v47, %s4654_s27 }
0x15c9   :  { %v2555_v37 = vpop.xlane.xlu0 %2554 }
0x15ca   :  { %v2559_v40 = vsub.f32 %v2551_v28, %v2555_v37 }
0x15cc   :  { %v2561_v41 = vmul.f32 1.442695, %v2559_v40 }
0x15cd   :  { %v2652_v42 = vpop.permute.xlu0 %2651  ;;  %v2558_v43 = vpop.xlane.xlu1 %2557 }
0x15ce   :  { %4560 = vpow2.f32 %v2561_v41  ;;  %v2560_v46 = vsub.f32 %v2552_v35, %v2558_v43  ;;  %4310 = vmatpush3.msra.mxu0 %v2652_v42 }
0x15cf   :  { %4319 = vmatprep.subr.mxu0 %v4647_v17 }
0x15d0   :  { %v2563_v60 = vmul.f32 1.442695, %v2560_v46 }
0x15d1   :  { %v2576_v48 = vpop.permute.xlu1 %2575 }
0x15d2   :  { %4562 = vpow2.f32 %v2563_v60  ;;  %4305 = vmatpush3.msra.mxu1 %v2576_v48 }
0x15d3   :  { %4314 = vmatprep.subr.mxu1 %v4647_v17 }
0x15d5   :  { %v2730_v56 = vpop.permute.xlu1 %2729 }
0x15d8   :  { %v4561_v50 = vpop.eup %4560 }
0x15d9   :  { %v2565_v51 = vsel %vm255_vm4, %v4561_v50, 0.0  ;;  %v2808_v0 = vpop.permute.xlu1 %2807 }
0x15da   :  { %2566 = vadd.xlane.f32.xlu0 %v2565_v51 }
0x15dc   :  { %v4563_v52 = vpop.eup %4562 }
0x15dd   :  { %v2568_v53 = vsel %vm255_vm4, %v4563_v52, 0.0  ;;  %v2806_v3 = vpop.permute.xlu1 %2805 }
0x15de   :  { %2569 = vadd.xlane.f32.xlu0 %v2568_v53 }
0x15f4   :  { %2727 = vrot.lane.b32.xlu0 %v5076_v49, %s4654_s27 }
0x1667   :  { %v2567_v54 = vpop.xlane.xlu0 %2566 }
0x1668   :  { %4564 = vrcp.f32 %v2567_v54 }
0x166b   :  { %v2570_v55 = vpop.xlane.xlu0 %2569 }
0x166c   :  { %4566 = vrcp.f32 %v2570_v55 }
0x166f   :  { %v2728_v2 = vpop.permute.xlu0 %2727 }
0x1672   :  { %v4565_v59 = vpop.eup %4564 }
0x1673   :  { %v2573_v61 = vmul.f32 %v4565_v59, %v4561_v50 }
0x1675   :  { %4307 = vmatmul.mubr.msk.f32.vlgmr.msra.gmra.mrb[22].mxu1 %vm255_vm4, %v2573_v61 }
0x1676   :  { %v4567_v62 = vpop.eup %4566  ;;  %4315 = vmatpush3.xpose.msk.msra.mxu1 %vm255_vm4, %v2730_v56  ;;  %4316 = vmatprep.mubr.msk.f32.mxu1 %vm4648_vm3, %v4647_v17 }
0x1677   :  { %v2574_v1 = vmul.f32 %v4567_v62, %v4563_v52  ;;  %4324 = vmatprep.subr.mxu1 %v4647_v17 }
0x1679   :  { %4312 = vmatmul.mubr.msk.f32.vlgmr.msra.gmra.mrb[34].mxu0 %vm255_vm4, %v2574_v1  ;;  %4317 = vmatmul.mubr.msk.f32.vlgmr.msra.gmra.mrb[24].mxu1 %vm255_vm4, %v2728_v2 }
0x167a   :  { %4320 = vmatpush3.xpose.msk.msra.mxu0 %vm255_vm4, %v2808_v0  ;;  %4321 = vmatprep.mubr.msk.f32.mxu0 %vm4648_vm3, %v4647_v17 }
0x167b   :  { %4329 = vmatprep.subr.mxu0 %v4647_v17  ;;  %4326 = vmatprep.mubr.msk.f32.mxu1 %vm4648_vm3, %v4647_v17 }
0x167d   :  { %4322 = vmatmul.mubr.msk.f32.vlgmr.msra.gmra.mrb[36].mxu0 %vm255_vm4, %v2806_v3 }
0x167e   :  { %4331 = vmatprep.mubr.msk.f32.mxu0 %vm4648_vm3, %v4647_v17 }
0x1748   :  { %v5166_v4 = vpop.f32.mrb[22].mxu1 }
0x1749   :  { %v4308_v5 = vpop.f32.mrb[23].mxu1 }
0x174c   :  { %v5168_v6 = vpop.f32.mrb[34].mxu0  ;;  %v2801_v7 = vpop.f32.mrb[24].mxu1 }
0x174d   :  { %v2883_v8 = vmul.f32 0.35355338, %v2801_v7  ;;  %v4313_v9 = vpop.f32.mrb[35].mxu0  ;;  %v4318_v10 = vpop.f32.mrb[25].mxu1 }
0x174f   :  { %v2885_v11 = vsel %vm255_vm4, %v2883_v8, -inf }
0x1750   :  { %2886 = vmax.xlane.f32.xlu0 %v2885_v11  ;;  %v2879_v12 = vpop.f32.mrb[36].mxu0 }
0x1751   :  { %v2884_v13 = vmul.f32 0.35355338, %v2879_v12  ;;  %v4323_v14 = vpop.f32.mrb[37].mxu0 }
0x1753   :  { %v2888_v16 = vsel %vm255_vm4, %v2884_v13, -inf }
0x1754   :  { %2889 = vmax.xlane.f32.xlu1 %v2888_v16 }
0x1765   :  { %2907 = vrot.lane.b32.xlu1 %v5076_v49, %s4656_s29 }
0x1766   :  { %2983 = vrot.lane.b32.xlu0 %v5074_v47, %s4656_s29  ;;  %s5357_s29 = smov 24  }
0x1769   :  { %3061 = vrot.lane.b32.xlu1 %v5076_v49, %s4657_s11 }
0x176d   :  { %3139 = vrot.lane.b32.xlu1 %v5074_v47, %s4657_s11  ;;  %s4663_s11 = smov [#allocation5]  }
0x1771   :  { %3137 = vrot.lane.b32.xlu1 %v5074_v47, %s4658_s26 }
0x17dd   :  { %v2887_v15 = vpop.xlane.xlu0 %2886 }
0x17de   :  { %v2891_v18 = vsub.f32 %v2883_v8, %v2887_v15 }
0x17e0   :  { %v2893_v19 = vmul.f32 1.442695, %v2891_v18  ;;  %v3973_v18 = vld [vmem:[%s5344_s6 + $0x28] sm:$0xff] }
0x17e1   :  { %v2984_v20 = vpop.permute.xlu0 %2983  ;;  %v2890_v23 = vpop.xlane.xlu1 %2889 }
0x17e2   :  { %4568 = vpow2.f32 %v2893_v19  ;;  %v2892_v24 = vsub.f32 %v2884_v13, %v2890_v23  ;;  %4330 = vmatpush3.msra.mxu0 %v2984_v20  ;;  %v3974_v20 = vld [vmem:[%s5344_s6 + $0x30] sm:$0xff]  ;;  %v3975_v23 = vld [vmem:[%s5344_s6 + $0x38] sm:$0xff] }
0x17e3   :  { %4339 = vmatprep.subr.mxu0 %v4647_v17 }
0x17e4   :  { %v2895_v26 = vmul.f32 1.442695, %v2892_v24  ;;  %v4458_v24 = vpack.c.bf16 %v3975_v23, %v3974_v20 }
0x17e5   :  { %v2908_v27 = vpop.permute.xlu1 %2907 }
0x17e6   :  { %4570 = vpow2.f32 %v2895_v26  ;;  %4325 = vmatpush3.msra.mxu1 %v2908_v27 }
0x17e7   :  { %4334 = vmatprep.subr.mxu1 %v4647_v17 }
0x17e9   :  { %v3062_v22 = vpop.permute.xlu1 %3061 }
0x17ec   :  { %v4569_v28 = vpop.eup %4568 }
0x17ed   :  { %v2897_v29 = vsel %vm255_vm4, %v4569_v28, 0.0  ;;  %v3140_v41 = vpop.permute.xlu1 %3139 }
0x17ee   :  { %2898 = vadd.xlane.f32.xlu0 %v2897_v29 }
0x17f0   :  { %v4571_v30 = vpop.eup %4570 }
0x17f1   :  { %v2900_v31 = vsel %vm255_vm4, %v4571_v30, 0.0  ;;  %v3138_v46 = vpop.permute.xlu1 %3137 }
0x17f2   :  { %2901 = vadd.xlane.f32.xlu0 %v2900_v31 }
0x1808   :  { %3059 = vrot.lane.b32.xlu0 %v5076_v49, %s4658_s26 }
0x187b   :  { %v2899_v32 = vpop.xlane.xlu0 %2898 }
0x187c   :  { %4572 = vrcp.f32 %v2899_v32 }
0x187f   :  { %v2902_v35 = vpop.xlane.xlu0 %2901 }
0x1880   :  { %4574 = vrcp.f32 %v2902_v35 }
0x1883   :  { %v3060_v43 = vpop.permute.xlu0 %3059 }
0x1886   :  { %v4573_v36 = vpop.eup %4572 }
0x1887   :  { %v2905_v37 = vmul.f32 %v4573_v36, %v4569_v28 }
0x1889   :  { %4327 = vmatmul.mubr.msk.f32.vlgmr.msra.gmra.mrb[26].mxu1 %vm255_vm4, %v2905_v37 }
0x188a   :  { %v4575_v40 = vpop.eup %4574  ;;  %4335 = vmatpush3.xpose.msk.msra.mxu1 %vm255_vm4, %v3062_v22  ;;  %4336 = vmatprep.mubr.msk.f32.mxu1 %vm4648_vm3, %v4647_v17 }
0x188b   :  { %v2906_v42 = vmul.f32 %v4575_v40, %v4571_v30  ;;  %4344 = vmatprep.subr.mxu1 %v4647_v17 }
0x188d   :  { %4332 = vmatmul.mubr.msk.f32.vlgmr.msra.gmra.mrb[38].mxu0 %vm255_vm4, %v2906_v42  ;;  %4337 = vmatmul.mubr.msk.f32.vlgmr.msra.gmra.mrb[28].mxu1 %vm255_vm4, %v3060_v43 }
0x188e   :  { %4340 = vmatpush3.xpose.msk.msra.mxu0 %vm255_vm4, %v3140_v41  ;;  %4341 = vmatprep.mubr.msk.f32.mxu0 %vm4648_vm3, %v4647_v17 }
0x188f   :  { %4349 = vmatprep.subr.mxu0 %v4647_v17  ;;  %4346 = vmatprep.mubr.msk.f32.mxu1 %vm4648_vm3, %v4647_v17 }
0x1891   :  { %4342 = vmatmul.mubr.msk.f32.vlgmr.msra.gmra.mrb[40].mxu0 %vm255_vm4, %v3138_v46 }
0x1892   :  { %4351 = vmatprep.mubr.msk.f32.mxu0 %vm4648_vm3, %v4647_v17 }
0x195c   :  { %v2979_v60 = vpop.f32.mrb[26].mxu1 }
0x195d   :  { %v4328_v48 = vpop.f32.mrb[27].mxu1 }
0x1960   :  { %v3055_v50 = vpop.f32.mrb[38].mxu0  ;;  %v3133_v51 = vpop.f32.mrb[28].mxu1 }
0x1961   :  { %v3215_v52 = vmul.f32 0.35355338, %v3133_v51  ;;  %v4333_v53 = vpop.f32.mrb[39].mxu0  ;;  %v4338_v54 = vpop.f32.mrb[29].mxu1 }
0x1963   :  { %v3217_v55 = vsel %vm255_vm4, %v3215_v52, -inf }
0x1964   :  { %3218 = vmax.xlane.f32.xlu0 %v3217_v55  ;;  %v3211_v56 = vpop.f32.mrb[40].mxu0 }
0x1965   :  { %v3216_v59 = vmul.f32 0.35355338, %v3211_v56  ;;  %v4343_v61 = vpop.f32.mrb[41].mxu0 }
0x1967   :  { %v3220_v62 = vsel %vm255_vm4, %v3216_v59, -inf }
0x1968   :  { %3221 = vmax.xlane.f32.xlu1 %v3220_v62 }
0x1979   :  { %3239 = vrot.lane.b32.xlu1 %v5076_v49, %s4659_s30 }
0x197d   :  { %3393 = vrot.lane.b32.xlu1 %v5166_v4, %s4646_s19 }
0x1981   :  { %3395 = vrot.lane.b32.xlu1 %v5168_v6, %s4646_s19 }
0x1985   :  { %3403 = vrot.lane.b32.xlu1 %v3055_v50, %s5356_s5 }
0x19f1   :  { %v3219_v0 = vpop.xlane.xlu0 %3218 }
0x19f2   :  { %v3223_v1 = vsub.f32 %v3215_v52, %v3219_v0 }
0x19f4   :  { %v3225_v2 = vmul.f32 1.442695, %v3223_v1 }
0x19f5   :  { %v3222_v3 = vpop.xlane.xlu1 %3221 }
0x19f6   :  { %4576 = vpow2.f32 %v3225_v2  ;;  %v3224_v5 = vsub.f32 %v3216_v59, %v3222_v3 }
0x19f8   :  { %v3227_v7 = vmul.f32 1.442695, %v3224_v5  ;;  %v3979_v5 = vld [vmem:[%s5346_s8 + $0x28] sm:$0xff] }
0x19f9   :  { %v3240_v8 = vpop.permute.xlu1 %3239 }
0x19fa   :  { %4578 = vpow2.f32 %v3227_v7  ;;  %4345 = vmatpush3.msra.mxu1 %v3240_v8  ;;  %v3980_v8 = vld [vmem:[%s5346_s8 + $0x30] sm:$0xff] }
0x19fd   :  { %v3394_v30 = vpop.permute.xlu1 %3393 }
0x19fe   :  { %v3415_v35 = vsel %vm255_vm4, %v5128_v25, %v3394_v30  ;;  %v5247_v25 = vld [vmem:[%s5345_s7 + $0x8] sm:$0x3f]  ;;  %s3892_s7 = sshll.u32 %s4663_s11, 4  ;;  %s3893_s7 = int_to_ptr.vmem [resolvable:$true] %s3892_s7 }
0x19ff   :  { %p4623_p9 = scmp.lt.s32.totalorder %s3893_s7, %s3893_s7 }
0x1a00   :  { %v4577_v9 = vpop.eup %4576 }
0x1a01   :  { %v3229_v49 = vsel %vm255_vm4, %v4577_v9, 0.0  ;;  %v3396_v31 = vpop.permute.xlu1 %3395 }
0x1a02   :  { %3230 = vadd.xlane.f32.xlu0 %v3229_v49  ;;  %v3416_v41 = vsel %vm255_vm4, %v5130_v21, %v3396_v31 }
0x1a04   :  { %v4579_v4 = vpop.eup %4578 }
0x1a05   :  { %v3232_v10 = vsel %vm255_vm4, %v4579_v4, 0.0  ;;  %v3404_v22 = vpop.permute.xlu1 %3403 }
0x1a06   :  { %3233 = vadd.xlane.f32.xlu0 %v3232_v10  ;;  %v3418_v42 = vsel %vm1605_vm6, %v3416_v41, %v3404_v22  ;;  %v3987_v10 = vld [vmem:[%s5348_s10 + $0x48] sm:$0xff] }
0x1a1c   :  { %3315 = vrot.lane.b32.xlu0 %v5074_v47, %s4659_s30  ;;  %v3972_v47 = vld [vmem:[%s5344_s6 + $0x20] sm:$0xff] }
0x1a1d   :  { %v4454_v19 = vpack.c.bf16 %v3973_v18, %v3972_v47 }
0x1a1f   :  { %4455 = vmatprep.subr.bf16.mxu1 %v4454_v19 }
0x1a20   :  { %3401 = vrot.lane.b32.xlu0 %v2979_v60, %s5356_s5  ;;  %v3429_v60 = vrot.slane %v5247_v25, %v1617_v58 }
0x1a8f   :  { %v3231_v6 = vpop.xlane.xlu0 %3230 }
0x1a90   :  { %4580 = vrcp.f32 %v3231_v6  ;;  %v3988_v6 = vld [vmem:[%s5348_s10 + $0x50] sm:$0xff] }
0x1a93   :  { %v3234_v11 = vpop.xlane.xlu0 %3233 }
0x1a94   :  { %4582 = vrcp.f32 %v3234_v11 }
0x1a97   :  { %v3316_v12 = vpop.permute.xlu0 %3315 }
0x1a98   :  { %4350 = vmatpush3.msra.mxu0 %v3316_v12  ;;  %v3989_v12 = vld [vmem:[%s5348_s10 + $0x58] sm:$0xff] }
0x1a9a   :  { %v4581_v13 = vpop.eup %4580 }
0x1a9b   :  { %v3237_v14 = vmul.f32 %v4581_v13, %v4577_v9  ;;  %v3402_v32 = vpop.permute.xlu0 %3401  ;;  %v3981_v9 = vld [vmem:[%s5346_s8 + $0x38] sm:$0xff]  ;;  %v4474_v13 = vpack.c.bf16 %v3989_v12, %v3988_v6 }
0x1a9c   :  { %v3417_v36 = vsel %vm1605_vm6, %v3415_v35, %v3402_v32  ;;  %v4466_v49 = vpack.c.bf16 %v3981_v9, %v3980_v8  ;;  %v4662_v8 = vmov 0.0|0.0  }
0x1a9d   :  { %4347 = vmatmul.mubr.msk.f32.vlgmr.msra.gmra.mrb[30].mxu1 %vm255_vm4, %v3237_v14  ;;  %v3990_v14 = vld [vmem:[%s5348_s10 + $0x60] sm:$0xff] }
0x1a9e   :  { %v4583_v16 = vpop.eup %4582  ;;  %4457 = vmatpush3.bf16.msra.mxu1 %v4454_v19 }
0x1a9f   :  { %v3238_v15 = vmul.f32 %v4583_v16, %v4579_v4  ;;  %4459 = vmatprep.subr.bf16.mxu1 %v4458_v24  ;;  %v3986_v4 = vld [vmem:[%s5348_s10 + $0x40] sm:$0xff]  ;;  %v3991_v16 = vld [vmem:[%s5348_s10 + $0x68] sm:$0xff] }
0x1aa0   :  { %v4470_v11 = vpack.c.bf16 %v3987_v10, %v3986_v4 }
0x1aa1   :  { %4352 = vmatmul.mubr.msk.f32.vlgmr.msra.gmra.mrb[42].mxu0 %vm255_vm4, %v3238_v15  ;;  %v4478_v15 = vpack.c.bf16 %v3991_v16, %v3990_v14  ;;  %v3772_v16 = vrot.slane %v5247_v25, %v1959_v33  ;;  %v3996_v33 = vld [vmem:[%s5350_s12] ss:$0 sm:$0xff]  ;;  %s4618_s12 = scalar_lea.vmem %s3893_s7, 32 }
0x1aa2   :  { %4461 = vmatpush3.bf16.msra.mxu1 %v4458_v24  ;;  %p4619_p8 = scmp.ne.s32.totalorder %s3893_s7, %s4618_s12  ;;  %p4624_p10 = scmp.lt.s32.totalorder %s4618_s12, %s4618_s12 }
0x1aa3   :  { %4471 = vmatprep.subr.bf16.mxu1 %v4470_v11 }
0x1aa4   :  { %p4625_p11 = por %p4624_p10, %p4623_p9 }
0x1aa6   :  { %p4626_p12 = pnand %p4625_p11, %p4619_p8 }
0x1b70   :  { %v3311_v26 = vpop.f32.mrb[30].mxu1 }
0x1b71   :  { %3409 = vrot.lane.b32.xlu0 %v3311_v26, %s5357_s29  ;;  %v4348_v27 = vpop.f32.mrb[31].mxu1  ;;  %v3542_v26 = vrot.slane %v5247_v25, %v1731_v38  ;;  %v3992_v38 = vld [vmem:[%s5348_s10 + $0x70] sm:$0xff] }
0x1b74   :  { %v3387_v28 = vpop.f32.mrb[42].mxu0 }
0x1b75   :  { %3411 = vrot.lane.b32.xlu1 %v3387_v28, %s5357_s29  ;;  %v4353_v29 = vpop.f32.mrb[43].mxu0 }
0x1b76   :  { %v3548_v29 = vrot.slane %v5247_v25, %v1737_v39  ;;  %v3993_v39 = vld [vmem:[%s5348_s10 + $0x78] sm:$0xff] }
0x1be3   :  { %v3410_v37 = vpop.permute.xlu0 %3409 }
0x1be4   :  { %v3419_v40 = vsel %vm1608_vm5, %v3417_v36, %v3410_v37  ;;  %v4482_v37 = vpack.c.bf16 %v3993_v39, %v3992_v38 }
0x1be5   :  { %4362 = vmatprep.mubr.msk.f32.mxu1 %vm170_vm2, %v3419_v40  ;;  %v3983_v40 = vld [vmem:[%s5347_s9 + $0x1] ss:$0 sm:$0xff] }
0x1be7   :  { %v3412_v43 = vpop.permute.xlu1 %3411 }
0x1be8   :  { %v3420_v46 = vsel %vm1608_vm5, %v3418_v42, %v3412_v43 }
0x1be9   :  { %4363 = vmatmul.mubr.msk.f32.vlgmr.msra.gmra.mrb[32].mxu1 %vm170_vm2, %v3420_v46 }
0x1bea   :  { %4473 = vmatpush3.bf16.msra.mxu1 %v4470_v11 }
0x1beb   :  { %4475 = vmatprep.subr.bf16.mxu1 %v4474_v13 }
0x1bee   :  { %4477 = vmatpush3.bf16.msra.mxu1 %v4474_v13 }
0x1bef   :  { %4479 = vmatprep.subr.bf16.mxu1 %v4478_v15 }
0x1bf2   :  { %4481 = vmatpush3.bf16.msra.mxu1 %v4478_v15 }
0x1bf3   :  { %4483 = vmatprep.subr.bf16.mxu1 %v4482_v37 }
0x1bf6   :  { %4485 = vmatpush3.bf16.msra.mxu1 %v4482_v37 }
0x1cbc   :  { %v4364_v48 = vpop.f32.mrb[32].mxu1 }
0x1cbd   :  { %v3508_v50 = vadd.f32 %v4364_v48, %v3429_v60  ;;  %v3502_v51 = vpop.f32.mrb[33].mxu1  ;;  %v3659_v48 = vrot.slane %v5247_v25, %v1845_v63 }
0x1cbe   :  { %v3503_v21 = vadd.f32 %v3502_v51, %v3429_v60 }
0x1cbf   :  { %v3512_v52 = vadd.f32 %v3508_v50, %v5063_v45 }
0x1cc0   :  { %v3511_v53 = vadd.f32 %v3503_v21, %v5061_v44  ;;  %v3978_v44 = vld [vmem:[%s5346_s8 + $0x20] sm:$0xff] }
0x1cc1   :  { %v3516_v54 = vsel %vm170_vm2, %v3512_v52, 0.0  ;;  %v4462_v7 = vpack.c.bf16 %v3979_v5, %v3978_v44  ;;  %v3789_v44 = vld [vmem:[#allocation2] sm:$0xff]  ;;  %v3790_v5 = vld [vmem:[#allocation2 + $0x8] sm:$0xff] }
0x1cc2   :  { %3517 = vadd.xlane.f32.xlu1 %v3516_v54  ;;  %v3513_v55 = vsel %vm170_vm2, %v3511_v53, 0.0  ;;  %v4487_v9 = vpack.c.bf16 %v3790_v5, %v3789_v44 }
0x1cc3   :  { %3514 = vadd.xlane.f32.xlu0 %v3513_v55  ;;  %4463 = vmatprep.subr.bf16.mxu0 %v4462_v7 }
0x1cc4   :  { %4465 = vmatpush3.bf16.msra.mxu0 %v4462_v7  ;;  %v3791_v7 = vld [vmem:[#allocation2 + $0x10] sm:$0xff] }
0x1cc5   :  { %4467 = vmatprep.subr.bf16.mxu0 %v4466_v49 }
0x1cc8   :  { %4469 = vmatpush3.bf16.msra.mxu0 %v4466_v49  ;;  %v3792_v49 = vld [vmem:[#allocation2 + $0x18] sm:$0xff] }
0x1cc9   :  { %4486 = vmatprep.subr.bf16.mxu0 %v4662_v8  ;;  %v4490_v4 = vpack.c.bf16 %v3792_v49, %v3791_v7 }
0x1d4f   :  { %v3518_v56 = vpop.xlane.xlu1 %3517 }
0x1d50   :  { %v3520_v59 = vmul.f32 0.03125, %v3518_v56  ;;  %v3515_v61 = vpop.xlane.xlu0 %3514 }
0x1d51   :  { %v3519_v62 = vmul.f32 0.03125, %v3515_v61 }
0x1d52   :  { %v3522_v0 = vsub.f32 %v3512_v52, %v3520_v59 }
0x1d53   :  { %v3521_v58 = vsub.f32 %v3511_v53, %v3519_v62 }
0x1d54   :  { %v3524_v3 = vmul.f32 %v3522_v0, %v3522_v0 }
0x1d55   :  { %v3523_v1 = vmul.f32 %v3521_v58, %v3521_v58 }
0x1d56   :  { %v3528_v45 = vsel %vm170_vm2, %v3524_v3, 0.0 }
0x1d57   :  { %v3525_v2 = vsel %vm170_vm2, %v3523_v1, 0.0 }
0x1d58   :  { %3526 = vadd.xlane.f32.xlu0 %v3525_v2 }
0x1d5c   :  { %3529 = vadd.xlane.f32.xlu0 %v3528_v45 }
0x1de5   :  { %v3527_v47 = vpop.xlane.xlu0 %3526 }
0x1de6   :  { %v3531_v18 = vmul.f32 0.03125, %v3527_v47 }
0x1de8   :  { %v3533_v19 = vadd.f32 1e-05, %v3531_v18 }
0x1de9   :  { %v3530_v20 = vpop.xlane.xlu0 %3529 }
0x1dea   :  { %4584 = vrsqrt.f32 %v3533_v19  ;;  %v3532_v23 = vmul.f32 0.03125, %v3530_v20  ;;  %v3778_v19 = vrot.slane %v5247_v25, %v1965_v34 }
0x1dec   :  { %v3534_v24 = vadd.f32 1e-05, %v3532_v23 }
0x1dee   :  { %4586 = vrsqrt.f32 %v3534_v24 }
0x1df4   :  { %v4585_v27 = vpop.eup %4584 }
0x1df5   :  { %v3537_v28 = vmul.f32 %v4585_v27, %v3521_v58 }
0x1df7   :  { %v3543_v30 = vmul.f32 %v3542_v26, %v3537_v28 }
0x1df8   :  { %v4587_v31 = vpop.eup %4586 }
0x1df9   :  { %v3538_v32 = vmul.f32 %v4587_v31, %v3522_v0  ;;  %v3549_v35 = vadd.f32 %v3548_v29, %v3543_v30 }
0x1dfb   :  { %v3544_v22 = vmul.f32 %v3542_v26, %v3538_v32  ;;  %4373 = vmatprep.mubr.msk.f32.mxu0 %vm170_vm2, %v3549_v35 }
0x1dfd   :  { %v3550_v36 = vadd.f32 %v3548_v29, %v3544_v22 }
0x1dff   :  { %4374 = vmatmul.mubr.msk.f32.vlgmr.msra.gmra.mrb[44].mxu0 %vm170_vm2, %v3550_v36 }
0x1e00   :  { %4403 = vmatprep.mubr.msk.f32.mxu0 %vm4648_vm3, %v4647_v17  ;;  %4488 = vmatpush3.bf16.msra.mxu0 %v4487_v9 }
0x1e01   :  { %4489 = vmatprep.subr.bf16.mxu0 %v4662_v8 }
0x1e04   :  { %4491 = vmatpush3.bf16.msra.mxu0 %v4490_v4 }
0x1ed2   :  { %v4375_v41 = vpop.f32.mrb[44].mxu0 }
0x1ed3   :  { %v3642_v42 = vadd.f32 %v4375_v41, %v3983_v40  ;;  %v3636_v43 = vpop.f32.mrb[45].mxu0 }
0x1ed4   :  { %v3637_v46 = vadd.f32 %v3983_v40, %v3636_v43 }
0x1ed5   :  { %v3646_v60 = vmax.f32 %v3642_v42, 0.0 }
0x1ed6   :  { %v3645_v17 = vmax.f32 %v3637_v46, 0.0 }
0x1ed8   :  { %4392 = vmatprep.mubr.msk.f32.mxu1 %vm1847_vm7, %v3645_v17 }
0x1ed9   :  { %4393 = vmatmul.mubr.msk.f32.vlgmr.msra.gmra.mrb[34].mxu1 %vm1847_vm7, %v3646_v60 }
0x1fac   :  { %v4394_v50 = vpop.f32.mrb[34].mxu1 }
0x1fad   :  { %v3738_v51 = vadd.f32 %v4394_v50, %v3659_v48  ;;  %v3732_v21 = vpop.f32.mrb[35].mxu1 }
0x1fae   :  { %v3733_v52 = vadd.f32 %v3732_v21, %v3659_v48 }
0x1faf   :  { %v3742_v53 = vadd.f32 %v3738_v51, %v3550_v36 }
0x1fb0   :  { %v3741_v54 = vadd.f32 %v3733_v52, %v3549_v35 }
0x1fb1   :  { %v3746_v55 = vsel %vm170_vm2, %v3742_v53, 0.0 }
0x1fb2   :  { %3747 = vadd.xlane.f32.xlu0 %v3746_v55  ;;  %v3743_v56 = vsel %vm170_vm2, %v3741_v54, 0.0 }
0x1fb3   :  { %3744 = vadd.xlane.f32.xlu1 %v3743_v56 }
0x203f   :  { %v3748_v59 = vpop.xlane.xlu0 %3747 }
0x2040   :  { %v3750_v61 = vmul.f32 0.03125, %v3748_v59  ;;  %v3745_v62 = vpop.xlane.xlu1 %3744 }
0x2041   :  { %v3749_v0 = vmul.f32 0.03125, %v3745_v62 }
0x2042   :  { %v3752_v58 = vsub.f32 %v3742_v53, %v3750_v61 }
0x2043   :  { %v3751_v1 = vsub.f32 %v3741_v54, %v3749_v0 }
0x2044   :  { %v3754_v2 = vmul.f32 %v3752_v58, %v3752_v58 }
0x2045   :  { %v3753_v63 = vmul.f32 %v3751_v1, %v3751_v1 }
0x2046   :  { %v3758_v3 = vsel %vm170_vm2, %v3754_v2, 0.0 }
0x2047   :  { %3759 = vadd.xlane.f32.xlu0 %v3758_v3  ;;  %v3755_v45 = vsel %vm170_vm2, %v3753_v63, 0.0 }
0x2048   :  { %3756 = vadd.xlane.f32.xlu1 %v3755_v45 }
0x20d4   :  { %v3760_v10 = vpop.xlane.xlu0 %3759 }
0x20d5   :  { %v3762_v6 = vmul.f32 0.03125, %v3760_v10  ;;  %v3757_v11 = vpop.xlane.xlu1 %3756 }
0x20d6   :  { %v3761_v12 = vmul.f32 0.03125, %v3757_v11 }
0x20d7   :  { %v3764_v13 = vadd.f32 1e-05, %v3762_v6 }
0x20d8   :  { %v3763_v14 = vadd.f32 1e-05, %v3761_v12 }
0x20d9   :  { %4588 = vrsqrt.f32 %v3764_v13 }
0x20da   :  { %4590 = vrsqrt.f32 %v3763_v14 }
0x20e3   :  { %v4589_v15 = vpop.eup %4588 }
0x20e4   :  { %v4591_v47 = vpop.eup %4590  ;;  %v3768_v18 = vmul.f32 %v4589_v15, %v3752_v58 }
0x20e5   :  { %v3767_v20 = vmul.f32 %v4591_v47, %v3751_v1 }
0x20e6   :  { %v3774_v23 = vmul.f32 %v3772_v16, %v3768_v18 }
0x20e7   :  { %v3773_v24 = vmul.f32 %v3772_v16, %v3767_v20 }
0x20e8   :  { %v3780_v26 = vadd.f32 %v3778_v19, %v3774_v23 }
0x20e9   :  { %v3779_v27 = vadd.f32 %v3778_v19, %v3773_v24 }
0x20ea   :  { %v3785_v28 = vrot.slane %v3780_v26, 6 }
0x20eb   :  { %v3782_v29 = vrot.slane %v3779_v27, 7 }
0x20ed   :  { %v3788_v30 = vsel %vm3787_vm8, %v3782_v29, %v3785_v28 }
0x20ee   :  { %4404 = vmatmul.mubr.msk.f32.vlgmr.msra.gmra.mrb[46].mxu0 %vm170_vm2, %v3788_v30 }
0x21c1   :  { %v3869_v31 = vpop.f32.mrb[46].mxu0 }
0x21c2   :  { %v3870_v57 = vadd.f32 %v3996_v33, %v3869_v31  ;;  %v4405_v32 = vpop.f32.mrb[47].mxu0 }
0x21c4   :  { %v3874_v34 = vsel %vm3873_vm9, %v3870_v57, -inf }
0x21c5   :  { %3875 = vmax.xlane.f32.xlu1 %v3874_v34 }
0x2252   :  { %v3876_v25 = vpop.xlane.xlu1 %3875 }
0x2253   :  { %v3877_v35 = vsub.f32 %v3870_v57, %v3876_v25 }
0x2255   :  { %v3878_v22 = vmul.f32 1.442695, %v3877_v35 }
0x2257   :  { %4592 = vpow2.f32 %v3878_v22 }
0x2261   :  { %v4593_v36 = vpop.eup %4592 }
0x2262   :  { %v3880_v38 = vsel %vm3873_vm9, %v4593_v36, 0.0 }
0x2263   :  { %3881 = vadd.xlane.f32.xlu0 %v3880_v38 }
0x22f0   :  { %v3882_v39 = vpop.xlane.xlu0 %3881 }
0x22f1   :  { %4594 = vrcp.f32 %v3882_v39 }
0x22fb   :  { %v4595_v37 = vpop.eup %4594 }
0x22fc   :  { %v3884_v40 = vmul.f32 %v4595_v37, %v4593_v36 }
0x22fe   :  { %3885 = vst [vmem:[#allocation5] sm:$0x3] %v3884_v40 }
0x22ff   :  { %4629 = shalt.err (!%p4626_p12)
}
0x2300   :  { %s4630_s1 = scalar_lea.hbm %s5351_s13, 32 }
0x2301   :  { %p4631_p13 = scmp.ne.s32.totalorder %s5351_s13, %s4630_s1  ;;  %p4634_p0 = scmp.lt.u32.totalorder %s4630_s1, %s5351_s13 }
0x2303   :  { %p4636_p1 = pnand %p4634_p0, %p4631_p13 }
0x2305   :  { %4639 = shalt.err (!%p4636_p1)
}
0x2306   :  { %3895 = dma.vmem_to_hbm [thread:$0]  %s3893_s7, 32, %s5351_s13, [#allocation4]  }
0x2307   :  { %4642 = dma.done.wait [#allocation4], 32  }
0x2308   :  { %4643 = vsyncadd [#allocation4], 4294967264 }
0x2309   :  { %3899 = vsyncpa [#allocation3], 1 }
0x230a   :  { %3900 = vsyncpa [#allocation4], 1 }

</bundles_post_ra>
